<compile_context>
chip_gen: v5e
topology: v5e:2x2
jax: 0.10.0
libtpu: 0.0.40
codegen_flags: <defaults>
</compile_context>

<pallas_src>
import jax
import jax.numpy as jnp
from jax.experimental import pallas as pl
from jax.experimental.pallas import tpu as pltpu


# ----------------------------- fused Pallas kernel ------------------------------

def _make_decoder_kernel(n_layers, B, H, E, V):
    """Build the fused kernel body for a static layer count / static shapes."""

    def kernel(tokens_ref, emb_ref, h_in_ref, c_in_ref, *rest):
        # rest = [w_cat_0, b_0, ..., w_cat_{L-1}, b_{L-1}, w_fc, b_fc,
        #         pred_out, h_out, c_out]
        layer_refs = rest[:2 * n_layers]
        w_fc_ref, b_fc_ref = rest[2 * n_layers:2 * n_layers + 2]
        pred_out_ref, h_out_ref, c_out_ref = rest[2 * n_layers + 2:]

        # ---- Embedding lookup as one-hot matmul (exact; no dynamic indexing) ----
        # tokens: [B, 1] int32 ; one_hot: [B, V] ; x = one_hot @ table -> [B, E]
        onehot = (tokens_ref[...] ==
                  jax.lax.broadcasted_iota(jnp.int32, (B, V), 1)
                  ).astype(jnp.float32)
        x = jnp.dot(onehot, emb_ref[...], preferred_element_type=jnp.float32)

        # ---- n_layers LSTM cells, one time step, statically unrolled ----
        for l in range(n_layers):
            w_ref = layer_refs[2 * l]        # [in_dim_l + H, 4H]
            b_ref = layer_refs[2 * l + 1]    # [1, 4H]
            h_prev = h_in_ref[l]             # [B, H]
            c_prev = c_in_ref[l]             # [B, H]

            # Single MXU dot per layer over the concatenated [x, h] input.
            xh = jnp.concatenate([x, h_prev], axis=-1)           # [B, in_dim_l + H]
            gates = (jnp.dot(xh, w_ref[...],
                             preferred_element_type=jnp.float32)
                     + b_ref[...])                               # [B, 4H]

            # H is a multiple of 128 -> lane-aligned slices (free views).
            i = jax.nn.sigmoid(gates[:, 0 * H:1 * H])
            f = jax.nn.sigmoid(gates[:, 1 * H:2 * H])
            g = jnp.tanh(gates[:, 2 * H:3 * H])
            o = jax.nn.sigmoid(gates[:, 3 * H:4 * H])

            c_new = f * c_prev + i * g
            h_new = o * jnp.tanh(c_new)

            h_out_ref[l] = h_new
            c_out_ref[l] = c_new
            x = h_new
            # TODO(synk): nn.LSTM inter-layer dropout (train-mode only) omitted;
            # eval-mode semantics are reproduced exactly.

        # ---- fc_out: [B, H] @ [H, V] + [1, V], lane-dense store ----
        pred_out_ref[...] = (jnp.dot(x, w_fc_ref[...],
                                     preferred_element_type=jnp.float32)
                             + b_fc_ref[...])

    return kernel


_VMEM = pl.BlockSpec(memory_space=pltpu.MemorySpace.VMEM)


def decoder_forward(params, tokens, hidden, cell):
    """Equivalent of Decoder.forward(input, hidden, cell).

    tokens: [B] int32, hidden/cell: [n_layers, B, H].
    Returns (prediction [B, output_dim], hidden, cell).
    """
    n_layers, B, H = hidden.shape
    V, E = params["embedding"].shape

    ins = [tokens.reshape(B, 1).astype(jnp.int32),
           params["embedding"], hidden, cell]
    for l in range(n_layers):
        ins += [params["w_cat_t"][l], params["b"][l]]
    ins += [params["w_fc_t"], params["b_fc"]]

    kernel = _make_decoder_kernel(n_layers, B, H, E, V)

    pred, h_new, c_new = pl.pallas_call(
        kernel,
        out_shape=(jax.ShapeDtypeStruct((B, V), jnp.float32),
                   jax.ShapeDtypeStruct((n_layers, B, H), jnp.float32),
                   jax.ShapeDtypeStruct((n_layers, B, H), jnp.float32)),
        in_specs=[_VMEM] * len(ins),
        out_specs=(_VMEM, _VMEM, _VMEM),
        compiler_params=pltpu.CompilerParams(vmem_limit_bytes=64 << 20),
    )(*ins)
    return pred, h_new, c_new


# ----------------------------- parameters ------------------------------

def init_decoder_params(key, output_dim, emb_dim, hid_dim, n_layers):
    """Synthetic params mirroring nn.Embedding / nn.LSTM / nn.Linear shapes.

    LSTM weights are stored pre-merged: w_cat_t[l] = [w_ih_l^T ; w_hh_l^T]
    of shape [in_dim_l + H, 4H], and b[l] = (b_ih_l + b_hh_l) as [1, 4H].
    """
    keys = jax.random.split(key, 1 + 3 * n_layers + 2)
    k_iter = iter(keys)
    scale = 1.0 / jnp.sqrt(jnp.float32(hid_dim))

    params = {
        "embedding": jax.random.normal(next(k_iter), (output_dim, emb_dim),
                                       jnp.float32) * 0.1,
        "w_cat_t": [],
        "b": [],
    }
    for l in range(n_layers):
        in_dim = emb_dim if l == 0 else hid_dim
        w_ih_t = jax.random.uniform(next(k_iter), (in_dim, 4 * hid_dim),
                                    jnp.float32, -scale, scale)
        w_hh_t = jax.random.uniform(next(k_iter), (hid_dim, 4 * hid_dim),
                                    jnp.float32, -scale, scale)
        params["w_cat_t"].append(jnp.concatenate([w_ih_t, w_hh_t], axis=0))
        params["b"].append(
            jax.random.uniform(next(k_iter), (1, 4 * hid_dim), jnp.float32,
                               -scale, scale))
    params["w_fc_t"] = jax.random.uniform(next(k_iter), (hid_dim, output_dim),
                                          jnp.float32, -scale, scale)
    params["b_fc"] = jax.random.uniform(next(k_iter), (1, output_dim),
                                        jnp.float32, -scale, scale)
    return params


# ----------------------------- pure-JAX reference ------------------------------

def decoder_reference(params, tokens, hidden, cell):
    x = params["embedding"][tokens]
    n_layers, _, H = hidden.shape
    hs, cs = [], []
    for l in range(n_layers):
        xh = jnp.concatenate([x, hidden[l]], axis=-1)
        gates = xh @ params["w_cat_t"][l] + params["b"][l]
        i = jax.nn.sigmoid(gates[:, 0 * H:1 * H])
        f = jax.nn.sigmoid(gates[:, 1 * H:2 * H])
        g = jnp.tanh(gates[:, 2 * H:3 * H])
        o = jax.nn.sigmoid(gates[:, 3 * H:4 * H])
        c_new = f * cell[l] + i * g
        h_new = o * jnp.tanh(c_new)
        hs.append(h_new)
        cs.append(c_new)
        x = h_new
    pred = x @ params["w_fc_t"] + params["b_fc"]
    return pred, jnp.stack(hs, 0), jnp.stack(cs, 0)


# ----------------------------------- main -----------------------------------

if __name__ == "__main__":
    # Lane-aligned small shapes (feature dims multiples of 128, batch = 8 sublanes).
    output_dim = 256   # vocab size
    emb_dim = 128
    hid_dim = 128
    n_layers = 2
    batch = 8

    key = jax.random.PRNGKey(0)
    k_params, k_tok, k_h, k_c = jax.random.split(key, 4)

    params = init_decoder_params(k_params, output_dim, emb_dim, hid_dim, n_layers)

    tokens = jax.random.randint(k_tok, (batch,), 0, output_dim, dtype=jnp.int32)
    hidden = jax.random.normal(k_h, (n_layers, batch, hid_dim), jnp.float32)
    cell = jax.random.normal(k_c, (n_layers, batch, hid_dim), jnp.float32)

    prediction, new_hidden, new_cell = decoder_forward(params, tokens, hidden, cell)
    jax.block_until_ready((prediction, new_hidden, new_cell))

    assert prediction.shape == (batch, output_dim)
    assert new_hidden.shape == (n_layers, batch, hid_dim)
    assert new_cell.shape == (n_layers, batch, hid_dim)

    # Numerical check against a pure-JAX reference (loose tol: MXU f32 matmul
    # uses multi-pass bf16 accumulation by default).
    ref_pred, ref_h, ref_c = decoder_reference(params, tokens, hidden, cell)
    assert jnp.allclose(prediction, ref_pred, rtol=2e-2, atol=2e-2)
    assert jnp.allclose(new_hidden, ref_h, rtol=2e-2, atol=2e-2)
    assert jnp.allclose(new_cell, ref_c, rtol=2e-2, atol=2e-2)

    print("KERNEL_OK")
</pallas_src>

<mosaic_0001>
module attributes {stable_mosaic.version = 11 : i64} {
  func.func @kernel(%arg0: memref<8x1xi32, #tpu.memory_space<vmem>>, %arg1: memref<256x128xf32, #tpu.memory_space<vmem>>, %arg2: memref<2x8x128xf32, #tpu.memory_space<vmem>>, %arg3: memref<2x8x128xf32, #tpu.memory_space<vmem>>, %arg4: memref<256x512xf32, #tpu.memory_space<vmem>>, %arg5: memref<1x512xf32, #tpu.memory_space<vmem>>, %arg6: memref<256x512xf32, #tpu.memory_space<vmem>>, %arg7: memref<1x512xf32, #tpu.memory_space<vmem>>, %arg8: memref<128x256xf32, #tpu.memory_space<vmem>>, %arg9: memref<1x256xf32, #tpu.memory_space<vmem>>, %arg10: memref<8x256xf32, #tpu.memory_space<vmem>>, %arg11: memref<2x8x128xf32, #tpu.memory_space<vmem>>, %arg12: memref<2x8x128xf32, #tpu.memory_space<vmem>>) attributes {dimension_semantics = [], scalar_prefetch = 0 : i64, scratch_operands = 0 : i64, tpu.core_type = #tpu.core_type<tc>} {
    %c0 = arith.constant 0 : index
    %c0_0 = arith.constant 0 : index
    %0 = vector.load %arg0[%c0, %c0_0] : memref<8x1xi32, #tpu.memory_space<vmem>>, vector<8x1xi32>
    %1 = tpu.iota {dimensions = array<i32: 1>} : vector<8x256xi32>
    %2 = vector.broadcast %0 : vector<8x1xi32> to vector<8x256xi32>
    %3 = arith.cmpi eq, %2, %1 : vector<8x256xi32>
    %4 = arith.extui %3 : vector<8x256xi1> to vector<8x256xi32>
    %5 = arith.sitofp %4 : vector<8x256xi32> to vector<8x256xf32>
    %c0_1 = arith.constant 0 : index
    %c0_2 = arith.constant 0 : index
    %6 = vector.load %arg1[%c0_1, %c0_2] : memref<256x128xf32, #tpu.memory_space<vmem>>, vector<256x128xf32>
    %cst = arith.constant dense<0.000000e+00> : vector<8x128xf32>
    %7 = tpu.matmul %5, %6, %cst {dimension_numbers = #tpu.dot_dimension_numbers<[1], [0], [0], [1], [0, 0, 1, 1], [], []>} : vector<8x256xf32>, vector<256x128xf32>, vector<8x128xf32> -> vector<8x128xf32>
    %c0_3 = arith.constant 0 : index
    %c0_4 = arith.constant 0 : index
    %c0_5 = arith.constant 0 : index
    %8 = vector.load %arg2[%c0_3, %c0_4, %c0_5] : memref<2x8x128xf32, #tpu.memory_space<vmem>>, vector<1x8x128xf32>
    %9 = vector.shape_cast %8 : vector<1x8x128xf32> to vector<8x128xf32>
    %c0_6 = arith.constant 0 : index
    %c0_7 = arith.constant 0 : index
    %c0_8 = arith.constant 0 : index
    %10 = vector.load %arg3[%c0_6, %c0_7, %c0_8] : memref<2x8x128xf32, #tpu.memory_space<vmem>>, vector<1x8x128xf32>
    %11 = vector.shape_cast %10 : vector<1x8x128xf32> to vector<8x128xf32>
    %12 = tpu.concatenate %7, %9 in 1 : vector<8x128xf32>, vector<8x128xf32> -> vector<8x256xf32>
    %c0_9 = arith.constant 0 : index
    %c0_10 = arith.constant 0 : index
    %13 = vector.load %arg4[%c0_9, %c0_10] : memref<256x512xf32, #tpu.memory_space<vmem>>, vector<256x512xf32>
    %cst_11 = arith.constant dense<0.000000e+00> : vector<8x512xf32>
    %14 = tpu.matmul %12, %13, %cst_11 {dimension_numbers = #tpu.dot_dimension_numbers<[1], [0], [0], [1], [0, 0, 1, 1], [], []>} : vector<8x256xf32>, vector<256x512xf32>, vector<8x512xf32> -> vector<8x512xf32>
    %c0_12 = arith.constant 0 : index
    %c0_13 = arith.constant 0 : index
    %15 = vector.load %arg5[%c0_12, %c0_13] : memref<1x512xf32, #tpu.memory_space<vmem>>, vector<1x512xf32>
    %16 = vector.broadcast %15 : vector<1x512xf32> to vector<8x512xf32>
    %17 = arith.addf %14, %16 : vector<8x512xf32>
    %18 = vector.extract_strided_slice %17 {offsets = [0, 0], sizes = [8, 128], strides = [1, 1]} : vector<8x512xf32> to vector<8x128xf32>
    %19 = arith.negf %18 : vector<8x128xf32>
    %20 = math.exp %19 : vector<8x128xf32>
    %cst_14 = arith.constant 1.000000e+00 : f32
    %21 = vector.broadcast %cst_14 : f32 to vector<8x128xf32>
    %22 = arith.addf %21, %20 : vector<8x128xf32>
    %23 = arith.divf %21, %22 : vector<8x128xf32>
    %24 = vector.extract_strided_slice %17 {offsets = [0, 128], sizes = [8, 128], strides = [1, 1]} : vector<8x512xf32> to vector<8x128xf32>
    %25 = arith.negf %24 : vector<8x128xf32>
    %26 = math.exp %25 : vector<8x128xf32>
    %cst_15 = arith.constant 1.000000e+00 : f32
    %27 = vector.broadcast %cst_15 : f32 to vector<8x128xf32>
    %28 = arith.addf %27, %26 : vector<8x128xf32>
    %29 = arith.divf %27, %28 : vector<8x128xf32>
    %30 = vector.extract_strided_slice %17 {offsets = [0, 256], sizes = [8, 128], strides = [1, 1]} : vector<8x512xf32> to vector<8x128xf32>
    %31 = math.tanh %30 : vector<8x128xf32>
    %32 = vector.extract_strided_slice %17 {offsets = [0, 384], sizes = [8, 128], strides = [1, 1]} : vector<8x512xf32> to vector<8x128xf32>
    %33 = arith.negf %32 : vector<8x128xf32>
    %34 = math.exp %33 : vector<8x128xf32>
    %cst_16 = arith.constant 1.000000e+00 : f32
    %35 = vector.broadcast %cst_16 : f32 to vector<8x128xf32>
    %36 = arith.addf %35, %34 : vector<8x128xf32>
    %37 = arith.divf %35, %36 : vector<8x128xf32>
    %38 = arith.mulf %29, %11 : vector<8x128xf32>
    %39 = arith.mulf %23, %31 : vector<8x128xf32>
    %40 = arith.addf %38, %39 : vector<8x128xf32>
    %41 = math.tanh %40 : vector<8x128xf32>
    %42 = arith.mulf %37, %41 : vector<8x128xf32>
    %c0_17 = arith.constant 0 : index
    %c0_18 = arith.constant 0 : index
    %c0_19 = arith.constant 0 : index
    %43 = vector.load %arg11[%c0_17, %c0_18, %c0_19] : memref<2x8x128xf32, #tpu.memory_space<vmem>>, vector<1x8x128xf32>
    %44 = vector.shape_cast %43 : vector<1x8x128xf32> to vector<8x128xf32>
    %45 = vector.shape_cast %42 : vector<8x128xf32> to vector<1x8x128xf32>
    tpu.vector_store %arg11[%c0_17, %c0_18, %c0_19], %45 {strides = array<i32>} : memref<2x8x128xf32, #tpu.memory_space<vmem>>, vector<1x8x128xf32>,
    %c0_20 = arith.constant 0 : index
    %c0_21 = arith.constant 0 : index
    %c0_22 = arith.constant 0 : index
    %46 = vector.load %arg12[%c0_20, %c0_21, %c0_22] : memref<2x8x128xf32, #tpu.memory_space<vmem>>, vector<1x8x128xf32>
    %47 = vector.shape_cast %46 : vector<1x8x128xf32> to vector<8x128xf32>
    %48 = vector.shape_cast %40 : vector<8x128xf32> to vector<1x8x128xf32>
    tpu.vector_store %arg12[%c0_20, %c0_21, %c0_22], %48 {strides = array<i32>} : memref<2x8x128xf32, #tpu.memory_space<vmem>>, vector<1x8x128xf32>,
    %c1 = arith.constant 1 : index
    %c0_23 = arith.constant 0 : index
    %c0_24 = arith.constant 0 : index
    %49 = vector.load %arg2[%c1, %c0_23, %c0_24] : memref<2x8x128xf32, #tpu.memory_space<vmem>>, vector<1x8x128xf32>
    %50 = vector.shape_cast %49 : vector<1x8x128xf32> to vector<8x128xf32>
    %c1_25 = arith.constant 1 : index
    %c0_26 = arith.constant 0 : index
    %c0_27 = arith.constant 0 : index
    %51 = vector.load %arg3[%c1_25, %c0_26, %c0_27] : memref<2x8x128xf32, #tpu.memory_space<vmem>>, vector<1x8x128xf32>
    %52 = vector.shape_cast %51 : vector<1x8x128xf32> to vector<8x128xf32>
    %53 = tpu.concatenate %42, %50 in 1 : vector<8x128xf32>, vector<8x128xf32> -> vector<8x256xf32>
    %c0_28 = arith.constant 0 : index
    %c0_29 = arith.constant 0 : index
    %54 = vector.load %arg6[%c0_28, %c0_29] : memref<256x512xf32, #tpu.memory_space<vmem>>, vector<256x512xf32>
    %cst_30 = arith.constant dense<0.000000e+00> : vector<8x512xf32>
    %55 = tpu.matmul %53, %54, %cst_30 {dimension_numbers = #tpu.dot_dimension_numbers<[1], [0], [0], [1], [0, 0, 1, 1], [], []>} : vector<8x256xf32>, vector<256x512xf32>, vector<8x512xf32> -> vector<8x512xf32>
    %c0_31 = arith.constant 0 : index
    %c0_32 = arith.constant 0 : index
    %56 = vector.load %arg7[%c0_31, %c0_32] : memref<1x512xf32, #tpu.memory_space<vmem>>, vector<1x512xf32>
    %57 = vector.broadcast %56 : vector<1x512xf32> to vector<8x512xf32>
    %58 = arith.addf %55, %57 : vector<8x512xf32>
    %59 = vector.extract_strided_slice %58 {offsets = [0, 0], sizes = [8, 128], strides = [1, 1]} : vector<8x512xf32> to vector<8x128xf32>
    %60 = arith.negf %59 : vector<8x128xf32>
    %61 = math.exp %60 : vector<8x128xf32>
    %cst_33 = arith.constant 1.000000e+00 : f32
    %62 = vector.broadcast %cst_33 : f32 to vector<8x128xf32>
    %63 = arith.addf %62, %61 : vector<8x128xf32>
    %64 = arith.divf %62, %63 : vector<8x128xf32>
    %65 = vector.extract_strided_slice %58 {offsets = [0, 128], sizes = [8, 128], strides = [1, 1]} : vector<8x512xf32> to vector<8x128xf32>
    %66 = arith.negf %65 : vector<8x128xf32>
    %67 = math.exp %66 : vector<8x128xf32>
    %cst_34 = arith.constant 1.000000e+00 : f32
    %68 = vector.broadcast %cst_34 : f32 to vector<8x128xf32>
    %69 = arith.addf %68, %67 : vector<8x128xf32>
    %70 = arith.divf %68, %69 : vector<8x128xf32>
    %71 = vector.extract_strided_slice %58 {offsets = [0, 256], sizes = [8, 128], strides = [1, 1]} : vector<8x512xf32> to vector<8x128xf32>
    %72 = math.tanh %71 : vector<8x128xf32>
    %73 = vector.extract_strided_slice %58 {offsets = [0, 384], sizes = [8, 128], strides = [1, 1]} : vector<8x512xf32> to vector<8x128xf32>
    %74 = arith.negf %73 : vector<8x128xf32>
    %75 = math.exp %74 : vector<8x128xf32>
    %cst_35 = arith.constant 1.000000e+00 : f32
    %76 = vector.broadcast %cst_35 : f32 to vector<8x128xf32>
    %77 = arith.addf %76, %75 : vector<8x128xf32>
    %78 = arith.divf %76, %77 : vector<8x128xf32>
    %79 = arith.mulf %70, %52 : vector<8x128xf32>
    %80 = arith.mulf %64, %72 : vector<8x128xf32>
    %81 = arith.addf %79, %80 : vector<8x128xf32>
    %82 = math.tanh %81 : vector<8x128xf32>
    %83 = arith.mulf %78, %82 : vector<8x128xf32>
    %c1_36 = arith.constant 1 : index
    %c0_37 = arith.constant 0 : index
    %c0_38 = arith.constant 0 : index
    %84 = vector.load %arg11[%c1_36, %c0_37, %c0_38] : memref<2x8x128xf32, #tpu.memory_space<vmem>>, vector<1x8x128xf32>
    %85 = vector.shape_cast %84 : vector<1x8x128xf32> to vector<8x128xf32>
    %86 = vector.shape_cast %83 : vector<8x128xf32> to vector<1x8x128xf32>
    tpu.vector_store %arg11[%c1_36, %c0_37, %c0_38], %86 {strides = array<i32>} : memref<2x8x128xf32, #tpu.memory_space<vmem>>, vector<1x8x128xf32>,
    %c1_39 = arith.constant 1 : index
    %c0_40 = arith.constant 0 : index
    %c0_41 = arith.constant 0 : index
    %87 = vector.load %arg12[%c1_39, %c0_40, %c0_41] : memref<2x8x128xf32, #tpu.memory_space<vmem>>, vector<1x8x128xf32>
    %88 = vector.shape_cast %87 : vector<1x8x128xf32> to vector<8x128xf32>
    %89 = vector.shape_cast %81 : vector<8x128xf32> to vector<1x8x128xf32>
    tpu.vector_store %arg12[%c1_39, %c0_40, %c0_41], %89 {strides = array<i32>} : memref<2x8x128xf32, #tpu.memory_space<vmem>>, vector<1x8x128xf32>,
    %c0_42 = arith.constant 0 : index
    %c0_43 = arith.constant 0 : index
    %90 = vector.load %arg8[%c0_42, %c0_43] : memref<128x256xf32, #tpu.memory_space<vmem>>, vector<128x256xf32>
    %cst_44 = arith.constant dense<0.000000e+00> : vector<8x256xf32>
    %91 = tpu.matmul %83, %90, %cst_44 {dimension_numbers = #tpu.dot_dimension_numbers<[1], [0], [0], [1], [0, 0, 1, 1], [], []>} : vector<8x128xf32>, vector<128x256xf32>, vector<8x256xf32> -> vector<8x256xf32>
    %c0_45 = arith.constant 0 : index
    %c0_46 = arith.constant 0 : index
    %92 = vector.load %arg9[%c0_45, %c0_46] : memref<1x256xf32, #tpu.memory_space<vmem>>, vector<1x256xf32>
    %93 = vector.broadcast %92 : vector<1x256xf32> to vector<8x256xf32>
    %94 = arith.addf %91, %93 : vector<8x256xf32>
    %c0_47 = arith.constant 0 : index
    %c0_48 = arith.constant 0 : index
    %95 = vector.load %arg10[%c0_47, %c0_48] : memref<8x256xf32, #tpu.memory_space<vmem>>, vector<8x256xf32>
    tpu.vector_store %arg10[%c0_47, %c0_48], %94 {strides = array<i32>} : memref<8x256xf32, #tpu.memory_space<vmem>>, vector<8x256xf32>,
    return
  }
}

</mosaic_0001>

<bundles_post_ra>
// kernel: tpu_custom_call.1
= control target key start
LH: loop header
LB: loop body
LE: loop exit
PB: predicated region body
PF: predicated region fallthrough
CT: control target
= control target key end

     0   :  { %18 = vsyncpa [#allocation3], 0  ;;  %s1566_s0 = inlined_call_operand.vmem [shape: s32[8,1], index: 0, kind: input, shape index: {}]   ;;  %s1567_s1 = inlined_call_operand.hbm [shape: f32[256,128], index: 1, kind: input, shape index: {}]   ;;  %s1568_s2 = inlined_call_operand.hbm [shape: f32[2,8,128], index: 2, kind: input, shape index: {}]   ;;  %s1569_s3 = inlined_call_operand.hbm [shape: f32[2,8,128], index: 3, kind: input, shape index: {}]   ;;  %s1570_s4 = inlined_call_operand.hbm [shape: f32[256,512], index: 4, kind: input, shape index: {}]   ;;  %s1571_s5 = inlined_call_operand.vmem [shape: f32[1,512], index: 5, kind: input, shape index: {}]   ;;  %s1572_s6 = inlined_call_operand.hbm [shape: f32[256,512], index: 6, kind: input, shape index: {}]   ;;  %s1573_s7 = inlined_call_operand.vmem [shape: f32[1,512], index: 7, kind: input, shape index: {}]   ;;  %s1574_s8 = inlined_call_operand.hbm [shape: f32[128,256], index: 8, kind: input, shape index: {}]   ;;  %s1575_s9 = inlined_call_operand.vmem [shape: f32[1,256], index: 9, kind: input, shape index: {}]   ;;  %s1576_s10 = inlined_call_operand.hbm [shape: f32[8,256], index: 10, kind: output, shape index: {0}]   ;;  %s1577_s11 = inlined_call_operand.hbm [shape: f32[2,8,128], index: 11, kind: output, shape index: {1}]   ;;  %s1578_s12 = inlined_call_operand.hbm [shape: f32[2,8,128], index: 12, kind: output, shape index: {2}]  }
   0x1   :  { %19 = vsyncpa [#allocation6], 0 }
   0x2   :  { %20 = vsyncpa [#allocation9], 0 }
   0x3   :  { %21 = vsyncpa [#allocation12], 0 }
   0x4   :  { %22 = vsyncpa [#allocation4], 0 }
   0x5   :  { %23 = vsyncpa [#allocation15], 0  ;;  %s43_s23 = sshll.u32 %s1568_s2, 4  ;;  %s1376_s24 = smov [#allocation5]   ;;  %s44_s23 = int_to_ptr.hbm [resolvable:$true] %s43_s23 }
   0x6   :  { %s45_s25 = sshll.u32 %s1376_s24, 4  ;;  %s69_s28 = sshll.u32 %s1570_s4, 4  ;;  %s46_s25 = int_to_ptr.vmem [resolvable:$true] %s45_s25  ;;  %s70_s28 = int_to_ptr.hbm [resolvable:$true] %s69_s28 }
   0x7   :  { %s1377_s29 = smov 128   ;;  %s1378_s30 = smov 8  }
   0x8   :  { %51 = dma.hbm_to_vmem [thread:$0]  %s44_s23, 256, %s46_s25, [#allocation6], %s1377_s29, %s1377_s29, %s1378_s30  }
   0x9   :  { %s1379_s13 = smov [#allocation8]   ;;  %s1380_s15 = smov 512  }
   0xa   :  { %s71_s14 = sshll.u32 %s1379_s13, 4  ;;  %s1381_s2 = smov 32   ;;  %s72_s14 = int_to_ptr.vmem [resolvable:$true] %s71_s14 }
   0xb   :  { %77 = dma.hbm_to_vmem [thread:$0]  %s70_s28, 16384, %s72_s14, [#allocation9], %s1380_s15, %s1380_s15, %s1381_s2  }
   0xc   :  { %s30_s18 = sshll.u32 %s1567_s1, 4  ;;  %s1382_s19 = smov [#allocation2]   ;;  %s31_s18 = int_to_ptr.hbm [resolvable:$true] %s30_s18 }
   0xd   :  { %s32_s4 = sshll.u32 %s1382_s19, 4  ;;  %s56_s22 = sshll.u32 %s1569_s3, 4  ;;  %s33_s4 = int_to_ptr.vmem [resolvable:$true] %s32_s4  ;;  %s57_s22 = int_to_ptr.hbm [resolvable:$true] %s56_s22 }
   0xe   :  { %38 = dma.hbm_to_vmem [thread:$0]  %s31_s18, 4096, %s33_s4, [#allocation3], %s1377_s29, %s1377_s29, %s1378_s30  }
   0xf   :  { %s1383_s23 = smov [#allocation7]   ;;  %s84_s27 = sshll.u32 %s1572_s6, 4  ;;  %s85_s27 = int_to_ptr.hbm [resolvable:$true] %s84_s27 }
  0x10   :  { %s58_s24 = sshll.u32 %s1383_s23, 4  ;;  %s99_s3 = sshll.u32 %s1574_s8, 4  ;;  %s59_s24 = int_to_ptr.vmem [resolvable:$true] %s58_s24  ;;  %s100_s3 = int_to_ptr.hbm [resolvable:$true] %s99_s3 }
  0x11   :  { %64 = dma.hbm_to_vmem [thread:$0]  %s57_s22, 256, %s59_s24, [#allocation6], %s1377_s29, %s1377_s29, %s1378_s30  }
  0x12   :  { %s1384_s13 = smov [#allocation10]   ;;  %s1385_s16 = smov [#allocation11]  }
  0x13   :  { %s86_s14 = sshll.u32 %s1384_s13, 4  ;;  %s101_s17 = sshll.u32 %s1385_s16, 4  ;;  %s87_s14 = int_to_ptr.vmem [resolvable:$true] %s86_s14  ;;  %s102_s17 = int_to_ptr.vmem [resolvable:$true] %s101_s17 }
  0x14   :  { %92 = dma.hbm_to_vmem [thread:$0]  %s85_s27, 16384, %s87_s14, [#allocation9], %s1380_s15, %s1380_s15, %s1381_s2  }
  0x15   :  { %s1386_s18 = smov 256   ;;  %s1387_s6 = smov 16  }
  0x16   :  { %107 = dma.hbm_to_vmem [thread:$0]  %s100_s3, 4096, %s102_s17, [#allocation12], %s1386_s18, %s1386_s18, %s1387_s6  }
  0x17   :  { %1364 = dma.done.wait [#allocation3], 4096  }
  0x18   :  { %1365 = vsyncadd [#allocation3], 4294963200 }
  0x19   :  { %1366 = dma.done.wait [#allocation6], 512  }
  0x1a   :  { %1367 = vsyncadd [#allocation6], 4294966784 }
  0x1b   :  { %1368 = dma.done.wait [#allocation9], 32768  }
  0x1c   :  { %1369 = vsyncadd [#allocation9], 4294934528 }
  0x1d   :  { %1370 = dma.done.wait [#allocation12], 4096  }
  0x1e   :  { %1371 = vsyncadd [#allocation12], 4294963200  ;;  %v1388_v0 = vmov 0   ;;  %v134_v1 = vld [vmem:[%s1566_s0] sm:$0xff]  ;;  %v162_v2 = vld [vmem:[#allocation2 + $0x78] sm:$0xff]  ;;  %s1050_s22 = sshll.u32 %s1577_s11, 4  ;;  %s1051_s22 = int_to_ptr.hbm [resolvable:$true] %s1050_s22 }
  0x1f   :  { %1115 = vset.pattern.permute.xlu0 %v1388_v0  ;;  %v178_v3 = vld [vmem:[#allocation2 + $0xf8] sm:$0xff]  ;;  %179 = vmatpush.msra.mxu0 %v162_v2  ;;  %v161_v4 = vld [vmem:[#allocation2 + $0x70] sm:$0xff]  ;;  %v160_v6 = vld [vmem:[#allocation2 + $0x68] sm:$0xff]  ;;  %s1391_s23 = smov [#allocation16]   ;;  %s1063_s27 = sshll.u32 %s1578_s12, 4  ;;  %s1064_s27 = int_to_ptr.hbm [resolvable:$true] %s1063_s27 }
  0x20   :  { %139 = vperm.xlu0 %1115, %v134_v1   ;;  %v177_v5 = vld [vmem:[#allocation2 + $0xf0] sm:$0xff]  ;;  %199 = vmatpush.msra.mxu1 %v178_v3  ;;  %v176_v7 = vld [vmem:[#allocation2 + $0xe8] sm:$0xff]  ;;  %v159_v8 = vld [vmem:[#allocation2 + $0x60] sm:$0xff]  ;;  %s1061_s24 = sshll.u32 %s1391_s23, 4  ;;  %s1392_s28 = smov [#allocation13]   ;;  %s1062_s24 = int_to_ptr.vmem [resolvable:$true] %s1061_s24 }
  0x21   :  { %180 = vmatpush.msra.mxu0 %v161_v4  ;;  %v175_v9 = vld [vmem:[#allocation2 + $0xe0] sm:$0xff]  ;;  %v158_v10 = vld [vmem:[#allocation2 + $0x58] sm:$0xff]  ;;  %v157_v12 = vld [vmem:[#allocation2 + $0x50] sm:$0xff]  ;;  %s1038_s3 = sshll.u32 %s1392_s28, 4  ;;  %s1040_s16 = sshll.u32 %s1576_s10, 4  ;;  %s1039_s3 = int_to_ptr.vmem [resolvable:$true] %s1038_s3  ;;  %s1041_s16 = int_to_ptr.hbm [resolvable:$true] %s1040_s16 }
  0x22   :  { %200 = vmatpush.msra.mxu1 %v177_v5  ;;  %v174_v11 = vld [vmem:[#allocation2 + $0xd8] sm:$0xff]  ;;  %v173_v13 = vld [vmem:[#allocation2 + $0xd0] sm:$0xff]  ;;  %v156_v14 = vld [vmem:[#allocation2 + $0x48] sm:$0xff] }
  0x23   :  { %181 = vmatpush.msra.mxu0 %v160_v6  ;;  %v172_v15 = vld [vmem:[#allocation2 + $0xc8] sm:$0xff]  ;;  %v155_v16 = vld [vmem:[#allocation2 + $0x40] sm:$0xff]  ;;  %v154_v18 = vld [vmem:[#allocation2 + $0x38] sm:$0xff] }
  0x24   :  { %201 = vmatpush.msra.mxu1 %v176_v7  ;;  %v171_v17 = vld [vmem:[#allocation2 + $0xc0] sm:$0xff]  ;;  %v170_v19 = vld [vmem:[#allocation2 + $0xb8] sm:$0xff]  ;;  %v153_v20 = vld [vmem:[#allocation2 + $0x30] sm:$0xff] }
  0x25   :  { %182 = vmatpush.msra.mxu0 %v159_v8  ;;  %v169_v21 = vld [vmem:[#allocation2 + $0xb0] sm:$0xff]  ;;  %v152_v22 = vld [vmem:[#allocation2 + $0x28] sm:$0xff]  ;;  %v151_v24 = vld [vmem:[#allocation2 + $0x20] sm:$0xff] }
  0x26   :  { %202 = vmatpush.msra.mxu1 %v175_v9  ;;  %v168_v23 = vld [vmem:[#allocation2 + $0xa8] sm:$0xff]  ;;  %v167_v25 = vld [vmem:[#allocation2 + $0xa0] sm:$0xff]  ;;  %v150_v26 = vld [vmem:[#allocation2 + $0x18] sm:$0xff] }
  0x27   :  { %183 = vmatpush.msra.mxu0 %v158_v10  ;;  %v166_v27 = vld [vmem:[#allocation2 + $0x98] sm:$0xff]  ;;  %v149_v28 = vld [vmem:[#allocation2 + $0x10] sm:$0xff]  ;;  %v148_v30 = vld [vmem:[#allocation2 + $0x8] sm:$0xff] }
  0x28   :  { %203 = vmatpush.msra.mxu1 %v174_v11  ;;  %v165_v29 = vld [vmem:[#allocation2 + $0x90] sm:$0xff]  ;;  %v164_v31 = vld [vmem:[#allocation2 + $0x88] sm:$0xff]  ;;  %v147_v32 = vld [vmem:[#allocation2] sm:$0xff] }
  0x29   :  { %184 = vmatpush.msra.mxu0 %v157_v12  ;;  %v163_v33 = vld [vmem:[#allocation2 + $0x80] sm:$0xff]  ;;  %v282_v35 = vld [vmem:[#allocation8 + $0x1e8] sm:$0xff]  ;;  %v135_v12 = vlaneseq }
  0x2a   :  { %204 = vmatpush.msra.mxu1 %v173_v13  ;;  %v281_v34 = vld [vmem:[#allocation8 + $0x1e0] sm:$0xff]  ;;  %v278_v38 = vld [vmem:[#allocation8 + $0x1c8] sm:$0xff] }
  0x2b   :  { %185 = vmatpush.msra.mxu0 %v156_v14  ;;  %v277_v36 = vld [vmem:[#allocation8 + $0x1c0] sm:$0xff]  ;;  %359 = vmatpush.msra.mxu2 %v281_v34  ;;  %v346_v39 = vld [vmem:[#allocation8 + $0x3e8] sm:$0xff] }
  0x2c   :  { %205 = vmatpush.msra.mxu1 %v172_v15  ;;  %v345_v37 = vld [vmem:[#allocation8 + $0x3e0] sm:$0xff]  ;;  %v274_v42 = vld [vmem:[#allocation8 + $0x1a8] sm:$0xff] }
  0x2d   :  { %186 = vmatpush.msra.mxu0 %v155_v16  ;;  %379 = vmatpush.msra.mxu3 %v345_v37  ;;  %v273_v40 = vld [vmem:[#allocation8 + $0x1a0] sm:$0xff]  ;;  %v342_v43 = vld [vmem:[#allocation8 + $0x3c8] sm:$0xff]  ;;  %v284_v37 = vld [vmem:[#allocation8 + $0x1f8] sm:$0xff] }
  0x2e   :  { %206 = vmatpush.msra.mxu1 %v171_v17  ;;  %v341_v41 = vld [vmem:[#allocation8 + $0x3c0] sm:$0xff]  ;;  %360 = vmatpush.msra.mxu2 %v277_v36  ;;  %v270_v46 = vld [vmem:[#allocation8 + $0x188] sm:$0xff]  ;;  %v283_v36 = vld [vmem:[#allocation8 + $0x1f0] sm:$0xff] }
  0x2f   :  { %187 = vmatpush.msra.mxu0 %v154_v18  ;;  %v337_v44 = vld [vmem:[#allocation8 + $0x3a0] sm:$0xff]  ;;  %380 = vmatpush.msra.mxu3 %v341_v41  ;;  %v338_v47 = vld [vmem:[#allocation8 + $0x3a8] sm:$0xff]  ;;  %v279_v41 = vld [vmem:[#allocation8 + $0x1d0] sm:$0xff] }
  0x30   :  { %207 = vmatpush.msra.mxu1 %v170_v19  ;;  %v269_v45 = vld [vmem:[#allocation8 + $0x180] sm:$0xff]  ;;  %361 = vmatpush.msra.mxu2 %v273_v40  ;;  %v334_v49 = vld [vmem:[#allocation8 + $0x388] sm:$0xff]  ;;  %v1389_v40 = vmov 1.0  }
  0x31   :  { %188 = vmatpush.msra.mxu0 %v153_v20  ;;  %v333_v48 = vld [vmem:[#allocation8 + $0x380] sm:$0xff]  ;;  %381 = vmatpush.msra.mxu3 %v337_v44  ;;  %v266_v51 = vld [vmem:[#allocation8 + $0x168] sm:$0xff]  ;;  %v348_v44 = vld [vmem:[#allocation8 + $0x3f8] sm:$0xff] }
  0x32   :  { %208 = vmatpush.msra.mxu1 %v169_v21  ;;  %v265_v50 = vld [vmem:[#allocation8 + $0x160] sm:$0xff]  ;;  %362 = vmatpush.msra.mxu2 %v269_v45  ;;  %v330_v53 = vld [vmem:[#allocation8 + $0x368] sm:$0xff]  ;;  %v136_v21 = vand.u32 127, %v135_v12  ;;  %v275_v45 = vld [vmem:[#allocation8 + $0x1b0] sm:$0xff] }
  0x33   :  { %189 = vmatpush.msra.mxu0 %v152_v22  ;;  %v329_v52 = vld [vmem:[#allocation8 + $0x360] sm:$0xff]  ;;  %382 = vmatpush.msra.mxu3 %v333_v48  ;;  %v262_v55 = vld [vmem:[#allocation8 + $0x148] sm:$0xff]  ;;  %v344_v48 = vld [vmem:[#allocation8 + $0x3d8] sm:$0xff] }
  0x34   :  { %209 = vmatpush.msra.mxu1 %v168_v23  ;;  %v261_v54 = vld [vmem:[#allocation8 + $0x140] sm:$0xff]  ;;  %363 = vmatpush.msra.mxu2 %v265_v50  ;;  %v326_v57 = vld [vmem:[#allocation8 + $0x348] sm:$0xff]  ;;  %v339_v50 = vld [vmem:[#allocation8 + $0x3b0] sm:$0xff] }
  0x35   :  { %190 = vmatpush.msra.mxu0 %v151_v24  ;;  %v325_v56 = vld [vmem:[#allocation8 + $0x340] sm:$0xff]  ;;  %383 = vmatpush.msra.mxu3 %v329_v52  ;;  %v258_v59 = vld [vmem:[#allocation8 + $0x128] sm:$0xff]  ;;  %v340_v52 = vld [vmem:[#allocation8 + $0x3b8] sm:$0xff] }
  0x36   :  { %210 = vmatpush.msra.mxu1 %v167_v25  ;;  %v257_v58 = vld [vmem:[#allocation8 + $0x120] sm:$0xff]  ;;  %364 = vmatpush.msra.mxu2 %v261_v54  ;;  %v322_v61 = vld [vmem:[#allocation8 + $0x328] sm:$0xff]  ;;  %v335_v54 = vld [vmem:[#allocation8 + $0x390] sm:$0xff] }
  0x37   :  { %191 = vmatpush.msra.mxu0 %v150_v26  ;;  %v321_v60 = vld [vmem:[#allocation8 + $0x320] sm:$0xff]  ;;  %384 = vmatpush.msra.mxu3 %v325_v56  ;;  %v254_v63 = vld [vmem:[#allocation8 + $0x108] sm:$0xff]  ;;  %v336_v56 = vld [vmem:[#allocation8 + $0x398] sm:$0xff] }
  0x38   :  { %211 = vmatpush.msra.mxu1 %v166_v27  ;;  %v253_v62 = vld [vmem:[#allocation8 + $0x100] sm:$0xff]  ;;  %365 = vmatpush.msra.mxu2 %v257_v58  ;;  %v318_v1 = vld [vmem:[#allocation8 + $0x308] sm:$0xff]  ;;  %v331_v58 = vld [vmem:[#allocation8 + $0x370] sm:$0xff] }
  0x39   :  { %192 = vmatpush.msra.mxu0 %v149_v28  ;;  %v317_v0 = vld [vmem:[#allocation8 + $0x300] sm:$0xff]  ;;  %385 = vmatpush.msra.mxu3 %v321_v60  ;;  %v250_v3 = vld [vmem:[#allocation8 + $0xe8] sm:$0xff]  ;;  %v332_v60 = vld [vmem:[#allocation8 + $0x378] sm:$0xff] }
  0x3a   :  { %212 = vmatpush.msra.mxu1 %v165_v29  ;;  %v249_v2 = vld [vmem:[#allocation8 + $0xe0] sm:$0xff]  ;;  %366 = vmatpush.msra.mxu2 %v253_v62  ;;  %v314_v5 = vld [vmem:[#allocation8 + $0x2e8] sm:$0xff]  ;;  %v327_v62 = vld [vmem:[#allocation8 + $0x350] sm:$0xff] }
  0x3b   :  { %193 = vmatpush.msra.mxu0 %v148_v30  ;;  %v313_v4 = vld [vmem:[#allocation8 + $0x2e0] sm:$0xff]  ;;  %386 = vmatpush.msra.mxu3 %v317_v0  ;;  %v246_v7 = vld [vmem:[#allocation8 + $0xc8] sm:$0xff]  ;;  %v137_v30 = vadd.s32 128, %v136_v21  ;;  %v328_v0 = vld [vmem:[#allocation8 + $0x358] sm:$0xff] }
  0x3c   :  { %213 = vmatpush.msra.mxu1 %v164_v31  ;;  %v245_v6 = vld [vmem:[#allocation8 + $0xc0] sm:$0xff]  ;;  %367 = vmatpush.msra.mxu2 %v249_v2  ;;  %v310_v9 = vld [vmem:[#allocation8 + $0x2c8] sm:$0xff]  ;;  %v323_v2 = vld [vmem:[#allocation8 + $0x330] sm:$0xff] }
  0x3d   :  { %194 = vmatpush.msra.mxu0 %v147_v32  ;;  %v309_v8 = vld [vmem:[#allocation8 + $0x2c0] sm:$0xff]  ;;  %387 = vmatpush.msra.mxu3 %v313_v4  ;;  %v242_v11 = vld [vmem:[#allocation8 + $0xa8] sm:$0xff]  ;;  %v324_v4 = vld [vmem:[#allocation8 + $0x338] sm:$0xff] }
  0x3e   :  { %214 = vmatpush.msra.mxu1 %v163_v33  ;;  %v241_v10 = vld [vmem:[#allocation8 + $0xa0] sm:$0xff]  ;;  %368 = vmatpush.msra.mxu2 %v245_v6  ;;  %v306_v14 = vld [vmem:[#allocation8 + $0x2a8] sm:$0xff]  ;;  %v319_v6 = vld [vmem:[#allocation8 + $0x310] sm:$0xff] }
  0x3f   :  { %399 = vmatpush.msrb.mxu0 %v282_v35  ;;  %v305_v13 = vld [vmem:[#allocation8 + $0x2a0] sm:$0xff]  ;;  %388 = vmatpush.msra.mxu3 %v309_v8  ;;  %v238_v16 = vld [vmem:[#allocation8 + $0x88] sm:$0xff]  ;;  %v320_v8 = vld [vmem:[#allocation8 + $0x318] sm:$0xff] }
  0x40   :  { %419 = vmatpush.msrb.mxu1 %v346_v39  ;;  %v237_v15 = vld [vmem:[#allocation8 + $0x80] sm:$0xff]  ;;  %369 = vmatpush.msra.mxu2 %v241_v10  ;;  %v302_v18 = vld [vmem:[#allocation8 + $0x288] sm:$0xff]  ;;  %v315_v10 = vld [vmem:[#allocation8 + $0x2f0] sm:$0xff] }
  0x41   :  { %400 = vmatpush.msrb.mxu0 %v278_v38  ;;  %v301_v17 = vld [vmem:[#allocation8 + $0x280] sm:$0xff]  ;;  %389 = vmatpush.msra.mxu3 %v305_v13  ;;  %v234_v20 = vld [vmem:[#allocation8 + $0x68] sm:$0xff]  ;;  %v316_v12 = vld [vmem:[#allocation8 + $0x2f8] sm:$0xff] }
  0x42   :  { %420 = vmatpush.msrb.mxu1 %v342_v43  ;;  %v233_v19 = vld [vmem:[#allocation8 + $0x60] sm:$0xff]  ;;  %370 = vmatpush.msra.mxu2 %v237_v15  ;;  %v298_v23 = vld [vmem:[#allocation8 + $0x268] sm:$0xff]  ;;  %v280_v43 = vld [vmem:[#allocation8 + $0x1d8] sm:$0xff] }
  0x43   :  { %401 = vmatpush.msrb.mxu0 %v274_v42  ;;  %v297_v22 = vld [vmem:[#allocation8 + $0x260] sm:$0xff]  ;;  %390 = vmatpush.msra.mxu3 %v301_v17  ;;  %v230_v25 = vld [vmem:[#allocation8 + $0x48] sm:$0xff]  ;;  %v347_v42 = vld [vmem:[#allocation8 + $0x3f0] sm:$0xff] }
  0x44   :  { %421 = vmatpush.msrb.mxu1 %v338_v47  ;;  %v229_v24 = vld [vmem:[#allocation8 + $0x40] sm:$0xff]  ;;  %371 = vmatpush.msra.mxu2 %v233_v19  ;;  %v294_v27 = vld [vmem:[#allocation8 + $0x248] sm:$0xff]  ;;  %v276_v47 = vld [vmem:[#allocation8 + $0x1b8] sm:$0xff] }
  0x45   :  { %402 = vmatpush.msrb.mxu0 %v270_v46  ;;  %v293_v26 = vld [vmem:[#allocation8 + $0x240] sm:$0xff]  ;;  %391 = vmatpush.msra.mxu3 %v297_v22  ;;  %v226_v29 = vld [vmem:[#allocation8 + $0x28] sm:$0xff]  ;;  %v343_v46 = vld [vmem:[#allocation8 + $0x3d0] sm:$0xff] }
  0x46   :  { %422 = vmatpush.msrb.mxu1 %v334_v49  ;;  %v225_v28 = vld [vmem:[#allocation8 + $0x20] sm:$0xff]  ;;  %372 = vmatpush.msra.mxu2 %v229_v24  ;;  %v290_v32 = vld [vmem:[#allocation8 + $0x228] sm:$0xff]  ;;  %v271_v49 = vld [vmem:[#allocation8 + $0x190] sm:$0xff] }
  0x47   :  { %403 = vmatpush.msrb.mxu0 %v266_v51  ;;  %v289_v31 = vld [vmem:[#allocation8 + $0x220] sm:$0xff]  ;;  %392 = vmatpush.msra.mxu3 %v293_v26  ;;  %v222_v34 = vld [vmem:[#allocation8 + $0x8] sm:$0xff]  ;;  %v272_v51 = vld [vmem:[#allocation8 + $0x198] sm:$0xff] }
  0x48   :  { %423 = vmatpush.msrb.mxu1 %v330_v53  ;;  %v221_v33 = vld [vmem:[#allocation8] sm:$0xff]  ;;  %373 = vmatpush.msra.mxu2 %v225_v28  ;;  %v286_v39 = vld [vmem:[#allocation8 + $0x208] sm:$0xff]  ;;  %v267_v53 = vld [vmem:[#allocation8 + $0x170] sm:$0xff] }
  0x49   :  { %404 = vmatpush.msrb.mxu0 %v262_v55  ;;  %393 = vmatpush.msra.mxu3 %v289_v31  ;;  %v285_v38 = vld [vmem:[#allocation8 + $0x200] sm:$0xff]  ;;  %v268_v55 = vld [vmem:[#allocation8 + $0x178] sm:$0xff]  ;;  %v243_v13 = vld [vmem:[#allocation8 + $0xb0] sm:$0xff] }
  0x4a   :  { %424 = vmatpush.msrb.mxu1 %v326_v57  ;;  %374 = vmatpush.msra.mxu2 %v221_v33  ;;  %v263_v57 = vld [vmem:[#allocation8 + $0x150] sm:$0xff]  ;;  %v244_v15 = vld [vmem:[#allocation8 + $0xb8] sm:$0xff] }
  0x4b   :  { %405 = vmatpush.msrb.mxu0 %v258_v59  ;;  %394 = vmatpush.msra.mxu3 %v285_v38  ;;  %v264_v59 = vld [vmem:[#allocation8 + $0x158] sm:$0xff]  ;;  %v239_v17 = vld [vmem:[#allocation8 + $0x90] sm:$0xff] }
  0x4c   :  { %425 = vmatpush.msrb.mxu1 %v322_v61  ;;  %439 = vmatpush.msrb.mxu2 %v283_v36  ;;  %v259_v61 = vld [vmem:[#allocation8 + $0x130] sm:$0xff]  ;;  %v240_v19 = vld [vmem:[#allocation8 + $0x98] sm:$0xff] }
  0x4d   :  { %406 = vmatpush.msrb.mxu0 %v254_v63  ;;  %459 = vmatpush.msrb.mxu3 %v347_v42  ;;  %v260_v63 = vld [vmem:[#allocation8 + $0x138] sm:$0xff]  ;;  %v303_v22 = vld [vmem:[#allocation8 + $0x290] sm:$0xff] }
  0x4e   :  { %426 = vmatpush.msrb.mxu1 %v318_v1  ;;  %440 = vmatpush.msrb.mxu2 %v279_v41  ;;  %v255_v1 = vld [vmem:[#allocation8 + $0x110] sm:$0xff]  ;;  %v304_v24 = vld [vmem:[#allocation8 + $0x298] sm:$0xff] }
  0x4f   :  { %407 = vmatpush.msrb.mxu0 %v250_v3  ;;  %460 = vmatpush.msrb.mxu3 %v343_v46  ;;  %v256_v3 = vld [vmem:[#allocation8 + $0x118] sm:$0xff]  ;;  %v231_v26 = vld [vmem:[#allocation8 + $0x50] sm:$0xff]  ;;  %v712_v46 = vld [vmem:[#allocation10 + $0x3e0] sm:$0xff] }
  0x50   :  { %427 = vmatpush.msrb.mxu1 %v314_v5  ;;  %441 = vmatpush.msrb.mxu2 %v275_v45  ;;  %v251_v5 = vld [vmem:[#allocation8 + $0xf0] sm:$0xff]  ;;  %v232_v28 = vld [vmem:[#allocation8 + $0x58] sm:$0xff]  ;;  %v644_v45 = vld [vmem:[#allocation10 + $0x1c0] sm:$0xff] }
  0x51   :  { %408 = vmatpush.msrb.mxu0 %v246_v7  ;;  %461 = vmatpush.msrb.mxu3 %v339_v50  ;;  %v252_v7 = vld [vmem:[#allocation8 + $0xf8] sm:$0xff]  ;;  %v295_v31 = vld [vmem:[#allocation8 + $0x250] sm:$0xff]  ;;  %v708_v50 = vld [vmem:[#allocation10 + $0x3c0] sm:$0xff] }
  0x52   :  { %428 = vmatpush.msrb.mxu1 %v310_v9  ;;  %442 = vmatpush.msrb.mxu2 %v271_v49  ;;  %v247_v9 = vld [vmem:[#allocation8 + $0xd0] sm:$0xff]  ;;  %v296_v33 = vld [vmem:[#allocation8 + $0x258] sm:$0xff]  ;;  %v640_v49 = vld [vmem:[#allocation10 + $0x1a0] sm:$0xff] }
  0x53   :  { %409 = vmatpush.msrb.mxu0 %v242_v11  ;;  %462 = vmatpush.msrb.mxu3 %v335_v54  ;;  %v248_v11 = vld [vmem:[#allocation8 + $0xd8] sm:$0xff]  ;;  %v287_v38 = vld [vmem:[#allocation8 + $0x210] sm:$0xff]  ;;  %v704_v54 = vld [vmem:[#allocation10 + $0x3a0] sm:$0xff] }
  0x54   :  { %429 = vmatpush.msrb.mxu1 %v306_v14  ;;  %443 = vmatpush.msrb.mxu2 %v267_v53  ;;  %v311_v14 = vld [vmem:[#allocation8 + $0x2d0] sm:$0xff]  ;;  %v224_v36 = vld [vmem:[#allocation8 + $0x18] sm:$0xff]  ;;  %v636_v53 = vld [vmem:[#allocation10 + $0x180] sm:$0xff] }
  0x55   :  { %410 = vmatpush.msrb.mxu0 %v238_v16  ;;  %463 = vmatpush.msrb.mxu3 %v331_v58  ;;  %v312_v16 = vld [vmem:[#allocation8 + $0x2d8] sm:$0xff]  ;;  %v700_v58 = vld [vmem:[#allocation10 + $0x380] sm:$0xff] }
  0x56   :  { %430 = vmatpush.msrb.mxu1 %v302_v18  ;;  %444 = vmatpush.msrb.mxu2 %v263_v57  ;;  %v307_v18 = vld [vmem:[#allocation8 + $0x2b0] sm:$0xff]  ;;  %v632_v57 = vld [vmem:[#allocation10 + $0x160] sm:$0xff] }
  0x57   :  { %411 = vmatpush.msrb.mxu0 %v234_v20  ;;  %464 = vmatpush.msrb.mxu3 %v327_v62  ;;  %v308_v20 = vld [vmem:[#allocation8 + $0x2b8] sm:$0xff]  ;;  %v696_v62 = vld [vmem:[#allocation10 + $0x360] sm:$0xff] }
  0x58   :  { %431 = vmatpush.msrb.mxu1 %v298_v23  ;;  %445 = vmatpush.msrb.mxu2 %v259_v61  ;;  %v236_v23 = vld [vmem:[#allocation8 + $0x78] sm:$0xff]  ;;  %v628_v61 = vld [vmem:[#allocation10 + $0x140] sm:$0xff] }
  0x59   :  { %412 = vmatpush.msrb.mxu0 %v230_v25  ;;  %465 = vmatpush.msrb.mxu3 %v323_v2  ;;  %v219_v25 = vld [vmem:[#allocation5] sm:$0xff] }
  0x5a   :  { %432 = vmatpush.msrb.mxu1 %v294_v27  ;;  %446 = vmatpush.msrb.mxu2 %v255_v1  ;;  %v299_v27 = vld [vmem:[#allocation8 + $0x270] sm:$0xff]  ;;  %v624_v1 = vld [vmem:[#allocation10 + $0x120] sm:$0xff] }
  0x5b   :  { %413 = vmatpush.msrb.mxu0 %v226_v29  ;;  %466 = vmatpush.msrb.mxu3 %v319_v6  ;;  %v300_v29 = vld [vmem:[#allocation8 + $0x278] sm:$0xff]  ;;  %v692_v2 = vld [vmem:[#allocation10 + $0x340] sm:$0xff] }
  0x5c   :  { %433 = vmatpush.msrb.mxu1 %v290_v32  ;;  %447 = vmatpush.msrb.mxu2 %v251_v5  ;;  %v228_v32 = vld [vmem:[#allocation8 + $0x38] sm:$0xff]  ;;  %v620_v5 = vld [vmem:[#allocation10 + $0x100] sm:$0xff] }
  0x5d   :  { %414 = vmatpush.msrb.mxu0 %v222_v34  ;;  %467 = vmatpush.msrb.mxu3 %v315_v10  ;;  %v223_v34 = vld [vmem:[#allocation8 + $0x10] sm:$0xff]  ;;  %v688_v6 = vld [vmem:[#allocation10 + $0x320] sm:$0xff] }
  0x5e   :  { %434 = vmatpush.msrb.mxu1 %v286_v39  ;;  %448 = vmatpush.msrb.mxu2 %v247_v9  ;;  %v288_v39 = vld [vmem:[#allocation8 + $0x218] sm:$0xff]  ;;  %v616_v9 = vld [vmem:[#allocation10 + $0xe0] sm:$0xff] }
  0x5f   :  { %468 = vmatpush.msrb.mxu3 %v311_v14  ;;  %v684_v10 = vld [vmem:[#allocation10 + $0x300] sm:$0xff] }
  0x60   :  { %449 = vmatpush.msrb.mxu2 %v243_v13  ;;  %395 = vmatmul.f32.vlgmr.msra.gmra.mxu3 %v219_v25  ;;  %v612_v13 = vld [vmem:[#allocation10 + $0xc0] sm:$0xff] }
  0x61   :  { %469 = vmatpush.msrb.mxu3 %v307_v18  ;;  %v680_v14 = vld [vmem:[#allocation10 + $0x2e0] sm:$0xff] }
  0x62   :  { %450 = vmatpush.msrb.mxu2 %v239_v17  ;;  %v608_v17 = vld [vmem:[#allocation10 + $0xa0] sm:$0xff] }
  0x63   :  { %470 = vmatpush.msrb.mxu3 %v303_v22  ;;  %v676_v18 = vld [vmem:[#allocation10 + $0x2c0] sm:$0xff] }
  0x64   :  { %v672_v22 = vld [vmem:[#allocation10 + $0x2a0] sm:$0xff] }
  0x65   :  { %471 = vmatpush.msrb.mxu3 %v299_v27  ;;  %v601_v27 = vld [vmem:[#allocation10 + $0x68] sm:$0xff] }
  0x67   :  { %472 = vmatpush.msrb.mxu3 %v295_v31  ;;  %v597_v31 = vld [vmem:[#allocation10 + $0x48] sm:$0xff] }
  0x92   :  { %v140_v35 = vpop.permute.xlu0 %139 }
  0x93   :  { %vm141_vm0 = vcmp.eq.s32.totalorder %v140_v35, %v136_v21  ;;  %vm142_vm1 = vcmp.eq.s32.totalorder %v140_v35, %v137_v30  ;;  %v235_v21 = vld [vmem:[#allocation8 + $0x70] sm:$0xff] }
  0x94   :  { %1090 = vmatmul.msk.f32.vlgmr.msra.gmra.mxu0 %vm141_vm0, %v1389_v40  ;;  %1091 = vmatmul.msk.f32.vlgmr.msra.gmra.mxu1 %vm142_vm1, %v1389_v40  ;;  %v227_v30 = vld [vmem:[#allocation8 + $0x30] sm:$0xff] }
  0x95   :  { %479 = vmatpush.msra.mxu0 %v284_v37  ;;  %499 = vmatpush.msra.mxu1 %v348_v44  ;;  %v291_v35 = vld [vmem:[#allocation8 + $0x230] sm:$0xff]  ;;  %v292_v37 = vld [vmem:[#allocation8 + $0x238] sm:$0xff]  ;;  %v649_v44 = vld [vmem:[#allocation10 + $0x1e8] sm:$0xff] }
  0x96   :  { %451 = vmatpush.msrb.mxu2 %v235_v21  ;;  %473 = vmatpush.msrb.mxu3 %v291_v35  ;;  %v604_v21 = vld [vmem:[#allocation10 + $0x80] sm:$0xff] }
  0x97   :  { %480 = vmatpush.msra.mxu0 %v280_v43  ;;  %500 = vmatpush.msra.mxu1 %v344_v48  ;;  %v648_v43 = vld [vmem:[#allocation10 + $0x1e0] sm:$0xff]  ;;  %v713_v48 = vld [vmem:[#allocation10 + $0x3e8] sm:$0xff] }
  0x98   :  { %452 = vmatpush.msrb.mxu2 %v231_v26  ;;  %474 = vmatpush.msrb.mxu3 %v287_v38  ;;  %v668_v26 = vld [vmem:[#allocation10 + $0x280] sm:$0xff] }
  0x99   :  { %481 = vmatpush.msra.mxu0 %v276_v47  ;;  %501 = vmatpush.msra.mxu1 %v340_v52  ;;  %v645_v47 = vld [vmem:[#allocation10 + $0x1c8] sm:$0xff]  ;;  %v660_v35 = vld [vmem:[#allocation10 + $0x240] sm:$0xff] }
  0x9a   :  { %453 = vmatpush.msrb.mxu2 %v227_v30  ;;  %475 = vmatmul.f32.vlgmr.msrb.gmra.mxu3 %v219_v25  ;;  %v709_v52 = vld [vmem:[#allocation10 + $0x3c8] sm:$0xff]  ;;  %v664_v30 = vld [vmem:[#allocation10 + $0x260] sm:$0xff] }
  0x9b   :  { %482 = vmatpush.msra.mxu0 %v272_v51  ;;  %502 = vmatpush.msra.mxu1 %v336_v56  ;;  %v641_v51 = vld [vmem:[#allocation10 + $0x1a8] sm:$0xff]  ;;  %v588_v38 = vld [vmem:[#allocation10] sm:$0xff] }
  0x9c   :  { %435 = vmatmul.f32.vlgmr.msrb.gmra.mxu1 %v219_v25  ;;  %454 = vmatpush.msrb.mxu2 %v223_v34  ;;  %v705_v56 = vld [vmem:[#allocation10 + $0x3a8] sm:$0xff]  ;;  %v592_v34 = vld [vmem:[#allocation10 + $0x20] sm:$0xff] }
  0x9d   :  { %483 = vmatpush.msra.mxu0 %v268_v55  ;;  %503 = vmatpush.msra.mxu1 %v332_v60  ;;  %v637_v55 = vld [vmem:[#allocation10 + $0x188] sm:$0xff] }
  0x9e   :  { %746 = vmatpush.msra.mxu3 %v712_v46  ;;  %v701_v60 = vld [vmem:[#allocation10 + $0x388] sm:$0xff]  ;;  %v652_v46 = vld [vmem:[#allocation10 + $0x200] sm:$0xff] }
  0x9f   :  { %484 = vmatpush.msra.mxu0 %v264_v59  ;;  %504 = vmatpush.msra.mxu1 %v328_v0  ;;  %v633_v59 = vld [vmem:[#allocation10 + $0x168] sm:$0xff] }
  0xa0   :  { %747 = vmatpush.msra.mxu3 %v708_v50  ;;  %v697_v0 = vld [vmem:[#allocation10 + $0x368] sm:$0xff]  ;;  %v647_v50 = vld [vmem:[#allocation10 + $0x1d8] sm:$0xff] }
  0xa1   :  { %485 = vmatpush.msra.mxu0 %v260_v63  ;;  %505 = vmatpush.msra.mxu1 %v324_v4  ;;  %v629_v63 = vld [vmem:[#allocation10 + $0x148] sm:$0xff] }
  0xa2   :  { %748 = vmatpush.msra.mxu3 %v704_v54  ;;  %v693_v4 = vld [vmem:[#allocation10 + $0x348] sm:$0xff]  ;;  %v642_v54 = vld [vmem:[#allocation10 + $0x1b0] sm:$0xff] }
  0xa3   :  { %486 = vmatpush.msra.mxu0 %v256_v3  ;;  %506 = vmatpush.msra.mxu1 %v320_v8  ;;  %v625_v3 = vld [vmem:[#allocation10 + $0x128] sm:$0xff] }
  0xa4   :  { %749 = vmatpush.msra.mxu3 %v700_v58  ;;  %v689_v8 = vld [vmem:[#allocation10 + $0x328] sm:$0xff] }
  0xa5   :  { %487 = vmatpush.msra.mxu0 %v252_v7  ;;  %507 = vmatpush.msra.mxu1 %v316_v12  ;;  %v621_v7 = vld [vmem:[#allocation10 + $0x108] sm:$0xff] }
  0xa6   :  { %750 = vmatpush.msra.mxu3 %v696_v62  ;;  %v685_v12 = vld [vmem:[#allocation10 + $0x308] sm:$0xff]  ;;  %v639_v62 = vld [vmem:[#allocation10 + $0x198] sm:$0xff] }
  0xa7   :  { %488 = vmatpush.msra.mxu0 %v248_v11  ;;  %508 = vmatpush.msra.mxu1 %v312_v16  ;;  %v617_v11 = vld [vmem:[#allocation10 + $0xe8] sm:$0xff] }
  0xa8   :  { %751 = vmatpush.msra.mxu3 %v692_v2  ;;  %v681_v16 = vld [vmem:[#allocation10 + $0x2e8] sm:$0xff]  ;;  %v634_v2 = vld [vmem:[#allocation10 + $0x170] sm:$0xff] }
  0xa9   :  { %489 = vmatpush.msra.mxu0 %v244_v15  ;;  %509 = vmatpush.msra.mxu1 %v308_v20  ;;  %v613_v15 = vld [vmem:[#allocation10 + $0xc8] sm:$0xff] }
  0xaa   :  { %752 = vmatpush.msra.mxu3 %v688_v6  ;;  %v677_v20 = vld [vmem:[#allocation10 + $0x2c8] sm:$0xff] }
  0xab   :  { %490 = vmatpush.msra.mxu0 %v240_v19  ;;  %510 = vmatpush.msra.mxu1 %v304_v24  ;;  %v609_v19 = vld [vmem:[#allocation10 + $0xa8] sm:$0xff] }
  0xac   :  { %753 = vmatpush.msra.mxu3 %v684_v10  ;;  %v673_v24 = vld [vmem:[#allocation10 + $0x2a8] sm:$0xff]  ;;  %v698_v10 = vld [vmem:[#allocation10 + $0x370] sm:$0xff] }
  0xad   :  { %491 = vmatpush.msra.mxu0 %v236_v23  ;;  %511 = vmatpush.msra.mxu1 %v300_v29  ;;  %v605_v23 = vld [vmem:[#allocation10 + $0x88] sm:$0xff]  ;;  %v596_v29 = vld [vmem:[#allocation10 + $0x40] sm:$0xff] }
  0xae   :  { %754 = vmatpush.msra.mxu3 %v680_v14  ;;  %v699_v14 = vld [vmem:[#allocation10 + $0x378] sm:$0xff] }
  0xaf   :  { %492 = vmatpush.msra.mxu0 %v232_v28  ;;  %512 = vmatpush.msra.mxu1 %v296_v33  ;;  %v669_v28 = vld [vmem:[#allocation10 + $0x288] sm:$0xff] }
  0xb0   :  { %755 = vmatpush.msra.mxu3 %v676_v18  ;;  %v665_v33 = vld [vmem:[#allocation10 + $0x268] sm:$0xff]  ;;  %v694_v18 = vld [vmem:[#allocation10 + $0x350] sm:$0xff] }
  0xb1   :  { %493 = vmatpush.msra.mxu0 %v228_v32  ;;  %513 = vmatpush.msra.mxu1 %v292_v37  ;;  %v1491_v32 = vld [vmem:[%s1571_s5] sm:$0xf]  ;;  %v661_v37 = vld [vmem:[#allocation10 + $0x248] sm:$0xff] }
  0xb2   :  { %756 = vmatpush.msra.mxu3 %v672_v22 }
  0xb3   :  { %494 = vmatpush.msra.mxu0 %v224_v36  ;;  %514 = vmatpush.msra.mxu1 %v288_v39  ;;  %v593_v36 = vld [vmem:[#allocation10 + $0x28] sm:$0xff]  ;;  %v656_v39 = vld [vmem:[#allocation10 + $0x220] sm:$0xff] }
  0xb4   :  { %515 = vmatmul.f32.vlgmr.msra.gmra.mxu1 %v219_v25  ;;  %v600_v25 = vld [vmem:[#allocation10 + $0x60] sm:$0xff]  ;;  %757 = vmatpush.msra.mxu3 %v668_v26  ;;  %v691_v26 = vld [vmem:[#allocation10 + $0x338] sm:$0xff] }
  0xb5   :  { %786 = vmatpush.msrb.mxu1 %v713_v48  ;;  %v646_v48 = vld [vmem:[#allocation10 + $0x1d0] sm:$0xff] }
  0xb6   :  { %758 = vmatpush.msra.mxu3 %v664_v30 }
  0xb7   :  { %787 = vmatpush.msrb.mxu1 %v709_v52  ;;  %v715_v52 = vld [vmem:[#allocation10 + $0x3f8] sm:$0xff] }
  0xb8   :  { %759 = vmatpush.msra.mxu3 %v660_v35  ;;  %v614_v35 = vld [vmem:[#allocation10 + $0xd0] sm:$0xff] }
  0xb9   :  { %788 = vmatpush.msrb.mxu1 %v705_v56  ;;  %v643_v56 = vld [vmem:[#allocation10 + $0x1b8] sm:$0xff] }
  0xba   :  { %760 = vmatpush.msra.mxu3 %v656_v39  ;;  %v610_v39 = vld [vmem:[#allocation10 + $0xb0] sm:$0xff] }
  0xbb   :  { %789 = vmatpush.msrb.mxu1 %v701_v60  ;;  %v638_v60 = vld [vmem:[#allocation10 + $0x190] sm:$0xff] }
  0xbc   :  { %761 = vmatpush.msra.mxu3 %v652_v46  ;;  %v607_v46 = vld [vmem:[#allocation10 + $0x98] sm:$0xff] }
  0xbd   :  { %790 = vmatpush.msrb.mxu1 %v697_v0 }
  0xbf   :  { %791 = vmatpush.msrb.mxu1 %v693_v4  ;;  %v635_v4 = vld [vmem:[#allocation10 + $0x178] sm:$0xff] }
  0xc1   :  { %792 = vmatpush.msrb.mxu1 %v689_v8 }
  0xc3   :  { %793 = vmatpush.msrb.mxu1 %v685_v12 }
  0xc5   :  { %794 = vmatpush.msrb.mxu1 %v681_v16 }
  0xc7   :  { %795 = vmatpush.msrb.mxu1 %v677_v20  ;;  %v695_v20 = vld [vmem:[#allocation10 + $0x358] sm:$0xff] }
  0xc9   :  { %796 = vmatpush.msrb.mxu1 %v673_v24  ;;  %v690_v24 = vld [vmem:[#allocation10 + $0x330] sm:$0xff] }
  0xcb   :  { %797 = vmatpush.msrb.mxu1 %v669_v28  ;;  %v686_v28 = vld [vmem:[#allocation10 + $0x310] sm:$0xff] }
  0xcd   :  { %798 = vmatpush.msrb.mxu1 %v665_v33  ;;  %v687_v33 = vld [vmem:[#allocation10 + $0x318] sm:$0xff] }
  0xcf   :  { %799 = vmatpush.msrb.mxu1 %v661_v37  ;;  %v615_v37 = vld [vmem:[#allocation10 + $0xd8] sm:$0xff] }
  0xe3   :  { %v396_v6 = vpop.f32.mrf.mxu3 }
 0x111   :  { %v196_v40 = vpop.f32.mrf.mxu0  ;;  %v216_v41 = vpop.f32.mrf.mxu1 }
 0x112   :  { %v217_v42 = vadd.f32 %v216_v41, %v196_v40  ;;  %v589_v40 = vld [vmem:[#allocation10 + $0x8] sm:$0xff]  ;;  %v352_v41 = vperm.slane %v1491_v32, 1 }
 0x114   :  { %375 = vmatmul.f32.vlgmr.msra.gmra.mxu2 %v217_v42  ;;  %415 = vmatmul.f32.vlgmr.msrb.gmra.mxu0 %v217_v42 }
 0x115   :  { %726 = vmatpush.msra.mxu2 %v648_v43  ;;  %766 = vmatpush.msrb.mxu0 %v649_v44  ;;  %v650_v43 = vld [vmem:[#allocation10 + $0x1f0] sm:$0xff]  ;;  %v651_v44 = vld [vmem:[#allocation10 + $0x1f8] sm:$0xff] }
 0x117   :  { %727 = vmatpush.msra.mxu2 %v644_v45  ;;  %767 = vmatpush.msrb.mxu0 %v645_v47  ;;  %v653_v47 = vld [vmem:[#allocation10 + $0x208] sm:$0xff] }
 0x119   :  { %728 = vmatpush.msra.mxu2 %v640_v49  ;;  %768 = vmatpush.msrb.mxu0 %v641_v51  ;;  %v436_v45 = vpop.f32.mrf.mxu1  ;;  %v714_v49 = vld [vmem:[#allocation10 + $0x3f0] sm:$0xff] }
 0x11a   :  { %826 = vmatpush.msrb.mxu3 %v714_v49  ;;  %v353_v49 = vperm.slane %v1491_v32, 2 }
 0x11b   :  { %729 = vmatpush.msra.mxu2 %v636_v53  ;;  %769 = vmatpush.msrb.mxu0 %v637_v55  ;;  %v710_v55 = vld [vmem:[#allocation10 + $0x3d0] sm:$0xff] }
 0x11c   :  { %455 = vmatmul.f32.vlgmr.msrb.gmra.mxu2 %v217_v42  ;;  %495 = vmatmul.f32.vlgmr.msra.gmra.mxu0 %v217_v42  ;;  %v657_v42 = vld [vmem:[#allocation10 + $0x228] sm:$0xff] }
 0x11d   :  { %730 = vmatpush.msra.mxu2 %v632_v57  ;;  %770 = vmatpush.msrb.mxu0 %v633_v59  ;;  %v711_v57 = vld [vmem:[#allocation10 + $0x3d8] sm:$0xff]  ;;  %v351_v59 = vperm.slane %v1491_v32, 0 }
 0x11e   :  { %800 = vmatpush.msrb.mxu1 %v657_v42  ;;  %827 = vmatpush.msrb.mxu3 %v710_v55  ;;  %v679_v42 = vld [vmem:[#allocation10 + $0x2d8] sm:$0xff] }
 0x11f   :  { %731 = vmatpush.msra.mxu2 %v628_v61  ;;  %771 = vmatpush.msrb.mxu0 %v629_v63  ;;  %v706_v61 = vld [vmem:[#allocation10 + $0x3b0] sm:$0xff]  ;;  %v707_v63 = vld [vmem:[#allocation10 + $0x3b8] sm:$0xff] }
 0x120   :  { %801 = vmatpush.msrb.mxu1 %v653_v47  ;;  %828 = vmatpush.msrb.mxu3 %v706_v61  ;;  %v675_v47 = vld [vmem:[#allocation10 + $0x2b8] sm:$0xff] }
 0x121   :  { %732 = vmatpush.msra.mxu2 %v624_v1  ;;  %772 = vmatpush.msrb.mxu0 %v625_v3  ;;  %v354_v1 = vperm.slane %v1491_v32, 3  ;;  %v702_v3 = vld [vmem:[#allocation10 + $0x390] sm:$0xff]  ;;  %v671_v55 = vld [vmem:[#allocation10 + $0x298] sm:$0xff] }
 0x122   :  { %866 = vmatpush.msra.mxu1 %v715_v52  ;;  %829 = vmatpush.msrb.mxu3 %v702_v3  ;;  %v662_v3 = vld [vmem:[#allocation10 + $0x250] sm:$0xff] }
 0x123   :  { %733 = vmatpush.msra.mxu2 %v620_v5  ;;  %773 = vmatpush.msrb.mxu0 %v621_v7  ;;  %v703_v7 = vld [vmem:[#allocation10 + $0x398] sm:$0xff] }
 0x124   :  { %867 = vmatpush.msra.mxu1 %v711_v57  ;;  %830 = vmatpush.msrb.mxu3 %v698_v10 }
 0x125   :  { %734 = vmatpush.msra.mxu2 %v616_v9  ;;  %774 = vmatpush.msrb.mxu0 %v617_v11  ;;  %v630_v9 = vld [vmem:[#allocation10 + $0x150] sm:$0xff]  ;;  %v631_v11 = vld [vmem:[#allocation10 + $0x158] sm:$0xff] }
 0x126   :  { %868 = vmatpush.msra.mxu1 %v707_v63  ;;  %831 = vmatpush.msrb.mxu3 %v694_v18  ;;  %v667_v63 = vld [vmem:[#allocation10 + $0x278] sm:$0xff] }
 0x127   :  { %735 = vmatpush.msra.mxu2 %v612_v13  ;;  %775 = vmatpush.msrb.mxu0 %v613_v15  ;;  %v655_v18 = vld [vmem:[#allocation10 + $0x218] sm:$0xff] }
 0x128   :  { %869 = vmatpush.msra.mxu1 %v703_v7  ;;  %832 = vmatpush.msrb.mxu3 %v690_v24  ;;  %v590_v7 = vld [vmem:[#allocation10 + $0x10] sm:$0xff] }
 0x129   :  { %736 = vmatpush.msra.mxu2 %v608_v17  ;;  %776 = vmatpush.msrb.mxu0 %v609_v19  ;;  %v626_v17 = vld [vmem:[#allocation10 + $0x130] sm:$0xff]  ;;  %v627_v19 = vld [vmem:[#allocation10 + $0x138] sm:$0xff] }
 0x12a   :  { %870 = vmatpush.msra.mxu1 %v699_v14  ;;  %833 = vmatpush.msrb.mxu3 %v686_v28 }
 0x12b   :  { %737 = vmatpush.msra.mxu2 %v604_v21  ;;  %777 = vmatpush.msrb.mxu0 %v605_v23  ;;  %v622_v23 = vld [vmem:[#allocation10 + $0x110] sm:$0xff] }
 0x12c   :  { %871 = vmatpush.msra.mxu1 %v695_v20 }
 0x12d   :  { %738 = vmatpush.msra.mxu2 %v600_v25  ;;  %778 = vmatpush.msrb.mxu0 %v601_v27  ;;  %v623_v25 = vld [vmem:[#allocation10 + $0x118] sm:$0xff]  ;;  %v618_v27 = vld [vmem:[#allocation10 + $0xf0] sm:$0xff] }
 0x12e   :  { %872 = vmatpush.msra.mxu1 %v691_v26 }
 0x12f   :  { %739 = vmatpush.msra.mxu2 %v596_v29  ;;  %779 = vmatpush.msrb.mxu0 %v597_v31  ;;  %v619_v31 = vld [vmem:[#allocation10 + $0xf8] sm:$0xff] }
 0x130   :  { %873 = vmatpush.msra.mxu1 %v687_v33 }
 0x131   :  { %740 = vmatpush.msra.mxu2 %v592_v34  ;;  %780 = vmatpush.msrb.mxu0 %v593_v36  ;;  %v516_v13 = vpop.f32.mrf.mxu1  ;;  %v682_v36 = vld [vmem:[#allocation10 + $0x2f0] sm:$0xff] }
 0x132   :  { %834 = vmatpush.msrb.mxu3 %v682_v36 }
 0x133   :  { %741 = vmatpush.msra.mxu2 %v588_v38  ;;  %781 = vmatpush.msrb.mxu0 %v589_v40  ;;  %v683_v38 = vld [vmem:[#allocation10 + $0x2f8] sm:$0xff]  ;;  %v678_v40 = vld [vmem:[#allocation10 + $0x2d0] sm:$0xff] }
 0x134   :  { %874 = vmatpush.msra.mxu1 %v683_v38  ;;  %835 = vmatpush.msrb.mxu3 %v678_v40 }
 0x135   :  { %806 = vmatpush.msrb.mxu2 %v650_v43  ;;  %846 = vmatpush.msra.mxu0 %v651_v44  ;;  %v606_v43 = vld [vmem:[#allocation10 + $0x90] sm:$0xff] }
 0x136   :  { %v674_v44 = vld [vmem:[#allocation10 + $0x2b0] sm:$0xff]  ;;  %875 = vmatpush.msra.mxu1 %v679_v42 }
 0x137   :  { %807 = vmatpush.msrb.mxu2 %v646_v48  ;;  %847 = vmatpush.msra.mxu0 %v647_v50  ;;  %v602_v50 = vld [vmem:[#allocation10 + $0x70] sm:$0xff] }
 0x138   :  { %836 = vmatpush.msrb.mxu3 %v674_v44  ;;  %876 = vmatpush.msra.mxu1 %v675_v47 }
 0x139   :  { %808 = vmatpush.msrb.mxu2 %v642_v54  ;;  %848 = vmatpush.msra.mxu0 %v643_v56  ;;  %v603_v54 = vld [vmem:[#allocation10 + $0x78] sm:$0xff] }
 0x13a   :  { %877 = vmatpush.msra.mxu1 %v671_v55  ;;  %v1536_v55 = vld [vmem:[%s1573_s7] sm:$0xf]  ;;  %s1390_s7 = smov [#allocation14]  }
 0x13b   :  { %809 = vmatpush.msrb.mxu2 %v638_v60  ;;  %849 = vmatpush.msra.mxu0 %v639_v62  ;;  %v666_v60 = vld [vmem:[#allocation10 + $0x270] sm:$0xff]  ;;  %v599_v62 = vld [vmem:[#allocation10 + $0x58] sm:$0xff]  ;;  %s1048_s4 = sshll.u32 %s1390_s7, 4  ;;  %s1049_s4 = int_to_ptr.vmem [resolvable:$true] %s1048_s4 }
 0x13c   :  { %878 = vmatpush.msra.mxu1 %v667_v63 }
 0x13d   :  { %810 = vmatpush.msrb.mxu2 %v634_v2  ;;  %850 = vmatpush.msra.mxu0 %v635_v4  ;;  %v594_v2 = vld [vmem:[#allocation10 + $0x30] sm:$0xff]  ;;  %v595_v4 = vld [vmem:[#allocation10 + $0x38] sm:$0xff] }
 0x13f   :  { %811 = vmatpush.msrb.mxu2 %v630_v9  ;;  %851 = vmatpush.msra.mxu0 %v631_v11  ;;  %v591_v11 = vld [vmem:[#allocation10 + $0x18] sm:$0xff] }
 0x141   :  { %812 = vmatpush.msrb.mxu2 %v626_v17  ;;  %852 = vmatpush.msra.mxu0 %v627_v19 }
 0x143   :  { %813 = vmatpush.msrb.mxu2 %v622_v23  ;;  %853 = vmatpush.msra.mxu0 %v623_v25 }
 0x145   :  { %814 = vmatpush.msrb.mxu2 %v618_v27  ;;  %854 = vmatpush.msra.mxu0 %v619_v31 }
 0x147   :  { %815 = vmatpush.msrb.mxu2 %v614_v35  ;;  %855 = vmatpush.msra.mxu0 %v615_v37 }
 0x149   :  { %816 = vmatpush.msrb.mxu2 %v610_v39 }
 0x14b   :  { %817 = vmatpush.msrb.mxu2 %v606_v43 }
 0x14d   :  { %818 = vmatpush.msrb.mxu2 %v602_v50  ;;  %v984_v50 = vld [vmem:[#allocation11 + $0xf8] sm:$0xff] }
 0x191   :  { %v416_v51 = vpop.f32.mrf.mxu0 }
 0x192   :  { %v417_v53 = vadd.f32 %v416_v51, %v352_v41  ;;  %v611_v41 = vld [vmem:[#allocation10 + $0xb8] sm:$0xff]  ;;  %v670_v51 = vld [vmem:[#allocation10 + $0x290] sm:$0xff] }
 0x193   :  { %856 = vmatpush.msra.mxu0 %v611_v41  ;;  %837 = vmatpush.msrb.mxu3 %v670_v51  ;;  %v981_v51 = vld [vmem:[#allocation11 + $0xe0] sm:$0xff] }
 0x194   :  { %v437_v58 = vadd.f32 %v436_v45, %v417_v53 }
 0x195   :  { %857 = vmatpush.msra.mxu0 %v607_v46  ;;  %838 = vmatpush.msrb.mxu3 %v666_v60 }
 0x196   :  { %v1093_v0 = vmul.f32 -1.442695, %v437_v58  ;;  %v585_v58 = vld [vmem:[#allocation5 + $0x8] sm:$0xff] }
 0x197   :  { %v376_v5 = vpop.f32.mrf.mxu2  ;;  %858 = vmatpush.msra.mxu0 %v603_v54  ;;  %762 = vmatmul.f32.vlgmr.msra.gmra.mxu3 %v585_v58  ;;  %v980_v54 = vld [vmem:[#allocation11 + $0xd8] sm:$0xff] }
 0x198   :  { %1116 = vpow2.f32 %v1093_v0  ;;  %v377_v8 = vadd.f32 %v376_v5, %v351_v59  ;;  %v598_v59 = vld [vmem:[#allocation10 + $0x50] sm:$0xff]  ;;  %802 = vmatmul.f32.vlgmr.msrb.gmra.mxu1 %v585_v58  ;;  %v663_v5 = vld [vmem:[#allocation10 + $0x258] sm:$0xff]  ;;  %839 = vmatpush.msrb.mxu3 %v662_v3 }
 0x199   :  { %v496_v12 = vpop.f32.mrf.mxu0  ;;  %819 = vmatpush.msrb.mxu2 %v598_v59  ;;  %859 = vmatpush.msra.mxu0 %v599_v62  ;;  %v976_v59 = vld [vmem:[#allocation11 + $0xb8] sm:$0xff]  ;;  %v974_v62 = vld [vmem:[#allocation11 + $0xa8] sm:$0xff] }
 0x19a   :  { %v397_v15 = vadd.f32 %v396_v6, %v377_v8  ;;  %v497_v16 = vadd.f32 %v496_v12, %v354_v1  ;;  %v476_v1 = vpop.f32.mrf.mxu3  ;;  %v658_v8 = vld [vmem:[#allocation10 + $0x230] sm:$0xff]  ;;  %v659_v12 = vld [vmem:[#allocation10 + $0x238] sm:$0xff]  ;;  %879 = vmatpush.msra.mxu1 %v663_v5  ;;  %v969_v5 = vld [vmem:[#allocation11 + $0x80] sm:$0xff] }
 0x19b   :  { %820 = vmatpush.msrb.mxu2 %v594_v2  ;;  %860 = vmatpush.msra.mxu0 %v595_v4  ;;  %v972_v2 = vld [vmem:[#allocation11 + $0x98] sm:$0xff]  ;;  %v718_v4 = vperm.slane %v1536_v55, 0 }
 0x19c   :  { %v1092_v21 = vmul.f32 -1.442695, %v397_v15  ;;  %v517_v22 = vadd.f32 %v516_v13, %v497_v16  ;;  %v654_v15 = vld [vmem:[#allocation10 + $0x210] sm:$0xff]  ;;  %840 = vmatpush.msrb.mxu3 %v658_v8  ;;  %880 = vmatpush.msra.mxu1 %v659_v12  ;;  %v721_v8 = vperm.slane %v1536_v55, 3 }
 0x19d   :  { %821 = vmatpush.msrb.mxu2 %v590_v7  ;;  %861 = vmatpush.msra.mxu0 %v591_v11 }
 0x19e   :  { %v1117_v29 = vpop.eup %1116  ;;  %1118 = vpow2.f32 %v1092_v21  ;;  %v1094_v30 = vmul.f32 -1.442695, %v517_v22  ;;  %841 = vmatpush.msrb.mxu3 %v654_v15  ;;  %881 = vmatpush.msra.mxu1 %v655_v18  ;;  %v966_v15 = vld [vmem:[#allocation11 + $0x68] sm:$0xff] }
 0x19f   :  { %v1496_v34 = vadd.f32 1.0, %v1117_v29  ;;  %v456_v53 = vpop.f32.mrf.mxu2  ;;  %842 = vmatmul.f32.vlgmr.msrb.gmra.mxu3 %v585_v58 }
 0x1a0   :  { %1120 = vpow2.f32 %v1094_v30  ;;  %v457_v61 = vadd.f32 %v456_v53, %v353_v49  ;;  %882 = vmatmul.f32.vlgmr.msra.gmra.mxu1 %v585_v58  ;;  %v220_v30 = vld [vmem:[#allocation7] sm:$0xff]  ;;  %1011 = vmatpush.msra.mxu3 %v984_v50  ;;  %v719_v58 = vperm.slane %v1536_v55, 1 }
 0x1a1   :  { %1122 = vrcp.f32 %v1496_v34  ;;  %v553_v17 = vand.u32 2147483648, %v1496_v34  ;;  %vm547_vm3 = vweird.f32 %v1496_v34  ;;  %v551_v21 = vand.u32 2147483647, %v1496_v34  ;;  %v983_v49 = vld [vmem:[#allocation11 + $0xf0] sm:$0xff] }
 0x1a2   :  { %v477_v10 = vadd.f32 %v476_v1, %v457_v61  ;;  %v979_v53 = vld [vmem:[#allocation11 + $0xd0] sm:$0xff]  ;;  %v973_v61 = vld [vmem:[#allocation11 + $0xa0] sm:$0xff] }
 0x1a3   :  { %v554_v27 = vor.u32 1.1754944e-38, %v553_v17  ;;  %vm552_vm7 = vcmp.eq.f32.partialorder %v551_v21, 8.507059e+37  ;;  %v971_v1 = vld [vmem:[#allocation11 + $0x90] sm:$0xff]  ;;  %v964_v21 = vld [vmem:[#allocation11 + $0x58] sm:$0xff] }
 0x1a4   :  { %v1119_v45 = vpop.eup %1118 }
 0x1a5   :  { %v1499_v48 = vadd.f32 1.0, %v1119_v45 }
 0x1a6   :  { %v1121_v52 = vpop.eup %1120 }
 0x1a7   :  { %v1502_v56 = vpop.eup %1122  ;;  %1124 = vrcp.f32 %v1499_v48  ;;  %v1505_v57 = vadd.f32 1.0, %v1121_v52  ;;  %v534_v23 = vand.u32 2147483648, %v1499_v48  ;;  %v532_v25 = vand.u32 2147483647, %v1499_v48  ;;  %v982_v52 = vld [vmem:[#allocation11 + $0xe8] sm:$0xff] }
 0x1a8   :  { %v543_v32 = vmul.f32 %v1502_v56, %v1496_v34  ;;  %vm548_vm2 = vweird.f32 %v1502_v56  ;;  %vm528_vm6 = vweird.f32 %v1499_v48  ;;  %1012 = vmatpush.msra.mxu3 %v982_v52 }
 0x1a9   :  { %1126 = vrcp.f32 %v1505_v57  ;;  %vm1520_vm4 = vmor %vm547_vm3, %vm548_vm2  ;;  %v535_v31 = vor.u32 1.1754944e-38, %v534_v23  ;;  %vm533_vm9 = vcmp.eq.f32.partialorder %v532_v25, 8.507059e+37  ;;  %v573_v42 = vand.u32 2147483648, %v1505_v57  ;;  %v962_v25 = vld [vmem:[#allocation11 + $0x48] sm:$0xff] }
 0x1aa   :  { %v544_v0 = vsub.f32 1.0, %v543_v32  ;;  %1128 = vtanh.f32 %v477_v10  ;;  %vm567_vm11 = vweird.f32 %v1505_v57  ;;  %v571_v43 = vand.u32 2147483647, %v1505_v57  ;;  %1013 = vmatpush.msra.mxu3 %v980_v54  ;;  %v975_v32 = vld [vmem:[#allocation11 + $0xb0] sm:$0xff]  ;;  %v968_v10 = vld [vmem:[#allocation11 + $0x78] sm:$0xff] }
 0x1ab   :  { %v574_v45 = vor.u32 1.1754944e-38, %v573_v42 }
 0x1ac   :  { %v545_v6 = vmul.f32 %v1502_v56, %v544_v0  ;;  %vm572_vm13 = vcmp.eq.f32.partialorder %v571_v43, 8.507059e+37 }
 0x1ad   :  { %v1125_v9 = vpop.eup %1124 }
 0x1ae   :  { %v524_v13 = vmul.f32 %v1125_v9, %v1499_v48  ;;  %v546_v14 = vadd.f32 %v1502_v56, %v545_v6  ;;  %vm529_vm5 = vweird.f32 %v1125_v9  ;;  %v970_v6 = vld [vmem:[#allocation11 + $0x88] sm:$0xff] }
 0x1af   :  { %v1127_v16 = vpop.eup %1126  ;;  %vm530_vm8 = vmor %vm528_vm6, %vm529_vm5 }
 0x1b0   :  { %v525_v19 = vsub.f32 1.0, %v524_v13  ;;  %v563_v20 = vmul.f32 %v1127_v16, %v1505_v57  ;;  %v550_v26 = vsel %vm1520_vm4, %v1502_v56, %v546_v14  ;;  %v1129_v35 = vpop.eup %1128  ;;  %vm568_vm10 = vweird.f32 %v1127_v16  ;;  %v977_v56 = vld [vmem:[#allocation11 + $0xc0] sm:$0xff]  ;;  %v978_v57 = vld [vmem:[#allocation11 + $0xc8] sm:$0xff] }
 0x1b1   :  { %v555_v33 = vsel %vm552_vm7, %v554_v27, %v550_v26  ;;  %vm569_vm12 = vmor %vm567_vm11, %vm568_vm10  ;;  %1014 = vmatpush.msra.mxu3 %v978_v57  ;;  %v965_v14 = vld [vmem:[#allocation11 + $0x60] sm:$0xff]  ;;  %v959_v26 = vld [vmem:[#allocation11 + $0x30] sm:$0xff] }
 0x1b2   :  { %v526_v24 = vmul.f32 %v1125_v9, %v525_v19  ;;  %v564_v28 = vsub.f32 1.0, %v563_v20  ;;  %v577_v38 = vmul.f32 %v555_v33, %v220_v30  ;;  %v963_v20 = vld [vmem:[#allocation11 + $0x50] sm:$0xff]  ;;  %v960_v27 = vld [vmem:[#allocation11 + $0x38] sm:$0xff]  ;;  %v957_v30 = vld [vmem:[#allocation11 + $0x20] sm:$0xff] }
 0x1b3   :  { %1015 = vmatpush.msra.mxu3 %v976_v59 }
 0x1b4   :  { %v527_v29 = vadd.f32 %v1125_v9, %v526_v24  ;;  %v565_v36 = vmul.f32 %v1127_v16, %v564_v28  ;;  %v961_v24 = vld [vmem:[#allocation11 + $0x40] sm:$0xff] }
 0x1b5   :  { %1016 = vmatpush.msra.mxu3 %v974_v62 }
 0x1b6   :  { %v531_v34 = vsel %vm530_vm8, %v1125_v9, %v527_v29  ;;  %v566_v41 = vadd.f32 %v1127_v16, %v565_v36  ;;  %v967_v9 = vld [vmem:[#allocation11 + $0x70] sm:$0xff]  ;;  %v953_v36 = vld [vmem:[#allocation11] sm:$0xff] }
 0x1b7   :  { %v536_v37 = vsel %vm533_vm9, %v535_v31, %v531_v34  ;;  %1017 = vmatpush.msra.mxu3 %v972_v2  ;;  %v958_v31 = vld [vmem:[#allocation11 + $0x28] sm:$0xff]  ;;  %v955_v34 = vld [vmem:[#allocation11 + $0x10] sm:$0xff]  ;;  %v587_v2 = vld [vmem:[#allocation7 + $0x8] sm:$0xff] }
 0x1b8   :  { %v578_v39 = vmul.f32 %v1129_v35, %v536_v37  ;;  %v570_v44 = vsel %vm569_vm12, %v1127_v16, %v566_v41  ;;  %v956_v35 = vld [vmem:[#allocation11 + $0x18] sm:$0xff]  ;;  %v954_v37 = vld [vmem:[#allocation11 + $0x8] sm:$0xff] }
 0x1b9   :  { %v575_v47 = vsel %vm572_vm13, %v574_v45, %v570_v44  ;;  %1018 = vmatpush.msra.mxu3 %v970_v6 }
 0x1ba   :  { %v579_v40 = vadd.f32 %v578_v39, %v577_v38 }
 0x1bb   :  { %1019 = vmatpush.msra.mxu3 %v968_v10 }
 0x1bc   :  { %1130 = vtanh.f32 %v579_v40  ;;  %583 = vst [vmem:[#allocation16] sm:$0xff] %v579_v40  ;;  %v720_v40 = vperm.slane %v1536_v55, 2 }
 0x1bd   :  { %1020 = vmatpush.msra.mxu3 %v966_v15 }
 0x1bf   :  { %1021 = vmatpush.msra.mxu3 %v964_v21 }
 0x1c1   :  { %1022 = vmatpush.msra.mxu3 %v962_v25 }
 0x1c2   :  { %v1131_v46 = vpop.eup %1130 }
 0x1c3   :  { %v581_v48 = vmul.f32 %v1131_v46, %v575_v47  ;;  %1023 = vmatpush.msra.mxu3 %v960_v27 }
 0x1c5   :  { %742 = vmatmul.f32.vlgmr.msra.gmra.mxu2 %v581_v48  ;;  %582 = vst [vmem:[#allocation14] sm:$0xff] %v581_v48  ;;  %782 = vmatmul.f32.vlgmr.msrb.gmra.mxu0 %v581_v48 }
 0x1c6   :  { %991 = vmatpush.msra.mxu2 %v983_v49  ;;  %1024 = vmatpush.msra.mxu3 %v958_v31 }
 0x1c8   :  { %992 = vmatpush.msra.mxu2 %v981_v51  ;;  %1025 = vmatpush.msra.mxu3 %v956_v35 }
 0x1ca   :  { %993 = vmatpush.msra.mxu2 %v979_v53  ;;  %1026 = vmatpush.msra.mxu3 %v954_v37 }
 0x1cc   :  { %994 = vmatpush.msra.mxu2 %v977_v56 }
 0x1cd   :  { %822 = vmatmul.f32.vlgmr.msrb.gmra.mxu2 %v581_v48  ;;  %862 = vmatmul.f32.vlgmr.msra.gmra.mxu0 %v581_v48 }
 0x1ce   :  { %995 = vmatpush.msra.mxu2 %v975_v32 }
 0x1d0   :  { %996 = vmatpush.msra.mxu2 %v973_v61 }
 0x1d2   :  { %997 = vmatpush.msra.mxu2 %v971_v1 }
 0x1d4   :  { %998 = vmatpush.msra.mxu2 %v969_v5 }
 0x1d6   :  { %999 = vmatpush.msra.mxu2 %v967_v9 }
 0x1d8   :  { %1000 = vmatpush.msra.mxu2 %v965_v14 }
 0x1da   :  { %1001 = vmatpush.msra.mxu2 %v963_v20  ;;  %v985_v20 = vld [vmem:[%s1575_s9] sm:$0x3] }
 0x1db   :  { %v987_v21 = vperm.slane %v985_v20, 0 }
 0x1dc   :  { %1002 = vmatpush.msra.mxu2 %v961_v24 }
 0x1de   :  { %1003 = vmatpush.msra.mxu2 %v959_v26 }
 0x1e0   :  { %1004 = vmatpush.msra.mxu2 %v957_v30 }
 0x1e2   :  { %1005 = vmatpush.msra.mxu2 %v955_v34 }
 0x1e4   :  { %1006 = vmatpush.msra.mxu2 %v953_v36 }
 0x215   :  { %v803_v60 = vpop.f32.mrf.mxu1 }
 0x21a   :  { %v763_v12 = vpop.f32.mrf.mxu3 }
 0x21d   :  { %v883_v17 = vpop.f32.mrf.mxu1 }
 0x222   :  { %v843_v48 = vpop.f32.mrf.mxu3 }
 0x242   :  { %v783_v63 = vpop.f32.mrf.mxu0 }
 0x243   :  { %v784_v0 = vadd.f32 %v783_v63, %v719_v58 }
 0x245   :  { %v804_v3 = vadd.f32 %v803_v60, %v784_v0 }
 0x247   :  { %v1096_v7 = vmul.f32 -1.442695, %v804_v3 }
 0x248   :  { %v743_v11 = vpop.f32.mrf.mxu2 }
 0x249   :  { %1132 = vpow2.f32 %v1096_v7  ;;  %v744_v13 = vadd.f32 %v743_v11, %v718_v4 }
 0x24a   :  { %v863_v16 = vpop.f32.mrf.mxu0 }
 0x24b   :  { %v764_v18 = vadd.f32 %v763_v12, %v744_v13  ;;  %v864_v19 = vadd.f32 %v863_v16, %v721_v8 }
 0x24d   :  { %v1095_v22 = vmul.f32 -1.442695, %v764_v18  ;;  %v884_v23 = vadd.f32 %v883_v17, %v864_v19 }
 0x24f   :  { %v1133_v28 = vpop.eup %1132  ;;  %1134 = vpow2.f32 %v1095_v22  ;;  %v1097_v29 = vmul.f32 -1.442695, %v884_v23  ;;  %v988_v22 = vperm.slane %v985_v20, 1 }
 0x250   :  { %v908_v33 = vadd.f32 1.0, %v1133_v28  ;;  %v823_v42 = vpop.f32.mrf.mxu2 }
 0x251   :  { %1136 = vpow2.f32 %v1097_v29  ;;  %v824_v46 = vadd.f32 %v823_v42, %v720_v40 }
 0x252   :  { %1138 = vrcp.f32 %v908_v33  ;;  %v920_v55 = vand.u32 2147483648, %v908_v33  ;;  %vm914_vm15 = vweird.f32 %v908_v33  ;;  %v918_v58 = vand.u32 2147483647, %v908_v33 }
 0x253   :  { %v844_v51 = vadd.f32 %v843_v48, %v824_v46 }
 0x254   :  { %v921_v63 = vor.u32 1.1754944e-38, %v920_v55  ;;  %vm919_vm3 = vcmp.eq.f32.partialorder %v918_v58, 8.507059e+37 }
 0x255   :  { %v1135_v38 = vpop.eup %1134 }
 0x256   :  { %v889_v39 = vadd.f32 1.0, %v1135_v38 }
 0x257   :  { %v1137_v41 = vpop.eup %1136 }
 0x258   :  { %v1139_v43 = vpop.eup %1138  ;;  %1140 = vrcp.f32 %v889_v39  ;;  %v928_v44 = vadd.f32 1.0, %v1137_v41  ;;  %v901_v59 = vand.u32 2147483648, %v889_v39  ;;  %v899_v61 = vand.u32 2147483647, %v889_v39 }
 0x259   :  { %v910_v45 = vmul.f32 %v1139_v43, %v908_v33  ;;  %vm915_vm14 = vweird.f32 %v1139_v43  ;;  %vm895_vm2 = vweird.f32 %v889_v39 }
 0x25a   :  { %1142 = vrcp.f32 %v928_v44  ;;  %vm1542_vm0 = vmor %vm914_vm15, %vm915_vm14  ;;  %v902_v3 = vor.u32 1.1754944e-38, %v901_v59  ;;  %vm900_vm5 = vcmp.eq.f32.partialorder %v899_v61, 8.507059e+37  ;;  %v940_v13 = vand.u32 2147483648, %v928_v44 }
 0x25b   :  { %v911_v47 = vsub.f32 1.0, %v910_v45  ;;  %1144 = vtanh.f32 %v844_v51  ;;  %vm934_vm7 = vweird.f32 %v928_v44  ;;  %v938_v14 = vand.u32 2147483647, %v928_v44 }
 0x25c   :  { %v941_v16 = vor.u32 1.1754944e-38, %v940_v13 }
 0x25d   :  { %v912_v49 = vmul.f32 %v1139_v43, %v911_v47  ;;  %vm939_vm9 = vcmp.eq.f32.partialorder %v938_v14, 8.507059e+37 }
 0x25e   :  { %v1141_v50 = vpop.eup %1140 }
 0x25f   :  { %v891_v52 = vmul.f32 %v1141_v50, %v889_v39  ;;  %v913_v53 = vadd.f32 %v1139_v43, %v912_v49  ;;  %vm896_vm1 = vweird.f32 %v1141_v50 }
 0x260   :  { %v1143_v54 = vpop.eup %1142  ;;  %vm897_vm4 = vmor %vm895_vm2, %vm896_vm1 }
 0x261   :  { %v892_v56 = vsub.f32 1.0, %v891_v52  ;;  %v930_v57 = vmul.f32 %v1143_v54, %v928_v44  ;;  %v917_v62 = vsel %vm1542_vm0, %v1139_v43, %v913_v53  ;;  %v1145_v6 = vpop.eup %1144  ;;  %vm935_vm6 = vweird.f32 %v1143_v54 }
 0x262   :  { %v922_v4 = vsel %vm919_vm3, %v921_v63, %v917_v62  ;;  %vm936_vm8 = vmor %vm934_vm7, %vm935_vm6 }
 0x263   :  { %v893_v60 = vmul.f32 %v1141_v50, %v892_v56  ;;  %v931_v0 = vsub.f32 1.0, %v930_v57  ;;  %v944_v9 = vmul.f32 %v922_v4, %v587_v2 }
 0x265   :  { %v894_v1 = vadd.f32 %v1141_v50, %v893_v60  ;;  %v932_v8 = vmul.f32 %v1143_v54, %v931_v0 }
 0x267   :  { %v898_v5 = vsel %vm897_vm4, %v1141_v50, %v894_v1  ;;  %v933_v12 = vadd.f32 %v1143_v54, %v932_v8 }
 0x268   :  { %v903_v7 = vsel %vm900_vm5, %v902_v3, %v898_v5 }
 0x269   :  { %v945_v10 = vmul.f32 %v1145_v6, %v903_v7  ;;  %v937_v15 = vsel %vm936_vm8, %v1143_v54, %v933_v12 }
 0x26a   :  { %v942_v18 = vsel %vm939_vm9, %v941_v16, %v937_v15 }
 0x26b   :  { %v946_v11 = vadd.f32 %v945_v10, %v944_v9 }
 0x26d   :  { %1146 = vtanh.f32 %v946_v11  ;;  %952 = vst [vmem:[#allocation16 + $0x8] sm:$0xff] %v946_v11 }
 0x273   :  { %v1147_v17 = vpop.eup %1146 }
 0x274   :  { %v948_v19 = vmul.f32 %v1147_v17, %v942_v18 }
 0x276   :  { %1007 = vmatmul.f32.vlgmr.msra.gmra.mxu2 %v948_v19  ;;  %950 = vst [vmem:[#allocation14 + $0x8] sm:$0xff] %v948_v19  ;;  %1027 = vmatmul.f32.vlgmr.msra.gmra.mxu3 %v948_v19 }
 0x277   :  { %1056 = dma.vmem_to_hbm [thread:$0]  %s1049_s4, 256, %s1051_s22, [#allocation15], %s1377_s29, %s1377_s29, %s1378_s30  }
 0x278   :  { %1069 = dma.vmem_to_hbm [thread:$0]  %s1062_s24, 256, %s1064_s27, [#allocation15], %s1377_s29, %s1377_s29, %s1378_s30  }
 0x2f9   :  { %v1008_v23 = vpop.f32.mrf.mxu2  ;;  %v1028_v24 = vpop.f32.mrf.mxu3 }
 0x2fa   :  { %v1009_v25 = vadd.f32 %v1008_v23, %v987_v21  ;;  %v1029_v26 = vadd.f32 %v1028_v24, %v988_v22 }
 0x2fc   :  { %1031 = vst [vmem:[#allocation13] sm:$0xff] %v1009_v25 }
 0x2fd   :  { %1032 = vst [vmem:[#allocation13 + $0x8] sm:$0xff] %v1029_v26 }
 0x2fe   :  { %1043 = dma.vmem_to_hbm [thread:$0]  %s1039_s3, 256, %s1041_s16, [#allocation4]  }
 0x2ff   :  { %1372 = dma.done.wait [#allocation4], 256  }
 0x300   :  { %1373 = vsyncadd [#allocation4], 4294967040 }
 0x301   :  { %1374 = dma.done.wait [#allocation15], 512  }
 0x302   :  { %1375 = vsyncadd [#allocation15], 4294966784 }
 0x303   :  { %1082 = vsyncpa [#allocation3], 1 }
 0x304   :  { %1083 = vsyncpa [#allocation6], 1 }
 0x305   :  { %1084 = vsyncpa [#allocation9], 1 }
 0x306   :  { %1085 = vsyncpa [#allocation12], 1 }
 0x307   :  { %1086 = vsyncpa [#allocation4], 1 }
 0x308   :  { %1087 = vsyncpa [#allocation15], 1 }

</bundles_post_ra>
